<compile_context>
chip_gen: v5e
topology: v5e:2x2
jax: 0.10.0
libtpu: 0.0.40
codegen_flags: <defaults>
</compile_context>

<pallas_src>
import functools

import jax
import jax.numpy as jnp
import numpy as np
from jax.experimental import pallas as pl
from jax.experimental.pallas import tpu as pltpu


def _channel_attention_kernel(x1_ref, x2_ref, w1_ref, wab_ref, b1_ref,
                              bab_ref, mask_ref, out_ref, *, W, mxu_dtype):
    x1 = x1_ref[0]                       # (C, L) f32, zero outside the interior
    x2 = x2_ref[0]                       # (C, L)
    C, L = x1.shape
    P = W + 2                            # padded row stride of one image plane
    offs = [(kh - 1) * P + (kw - 1) for kh in range(3) for kw in range(3)]

    def im2col(v):
        # v: (rows, L) with zeros on halo/pad lanes.  Row t*rows + r of the
        # result is v row r lane-shifted by tap offset offs[t], realised as a
        # static XLU lane rotation.  Interior output lanes never read wrapped
        # data; wrapped lanes only feed halo/pad outputs (masked or cropped).
        taps = []
        for o in offs:
            s = (-o) % L
            taps.append(v if s == 0 else pltpu.roll(v, s, 1))
        return jnp.concatenate(taps, axis=0)          # (9*rows, L)

    # Per-pixel channel outer product, channel-major: c[i*C + j] = x1[i]*x2[j].
    # Halo/pad lanes of x1/x2 are zero, so c inherits the zero surround.
    c = jnp.concatenate([x1[i:i + 1, :] * x2 for i in range(C)], axis=0)

    mask = mask_ref[...]                 # (1, L): 1 on interior pixels, else 0

    # conv1 (C*C -> C, 3x3, pad 1) + folded BN1 as one matmul, K = 9*C*C.
    # Re-zero halo/pad lanes so c_mid is correctly zero-padded for conv2/conv3.
    c_mid = (jnp.dot(w1_ref[...], im2col(c).astype(mxu_dtype),
                     preferred_element_type=jnp.float32)
             + b1_ref[...]) * mask                    # (C, L)

    # conv2 & conv3 (C -> C, 3x3, pad 1) + folded BN2/BN3: one shared im2col,
    # one stacked (2C, 9C) matmul; rows [0,C) = alpha, rows [C,2C) = beta.
    ab = jnp.dot(wab_ref[...], im2col(c_mid).astype(mxu_dtype),
                 preferred_element_type=jnp.float32) + bab_ref[...]  # (2C, L)

    # ret = alpha * x1 + beta + x2 (halo/pad lanes are don't-care; wrapper crops)
    out_ref[0] = (ab[:C] * x1 + ab[C:] + x2).astype(out_ref.dtype)


def channel_attention(x1, x2, params, *, mxu_dtype=jnp.bfloat16):
    """x1, x2: (N, C, H, W) float32 (PyTorch NCHW convention). Returns NCHW."""
    N, C, H, W = x1.shape
    CC = C * C
    Lp = (H + 2) * (W + 2)
    Lpad = ((Lp + 127) // 128) * 128     # lane-dense stores (multiple of 128)

    # Pack Nb batch images per grid step along the lane axis when C is small.
    Nb = 1
    if C < 8:
        for d in range(min(N, max(1, 8 // C)), 0, -1):
            if N % d == 0:
                Nb = d
                break
    G = N // Nb
    L = Nb * Lpad

    def fold_bn(gamma, beta, mean, var, eps=1e-5):
        scale = gamma / jnp.sqrt(var + eps)
        shift = beta - mean * scale
        return scale.astype(jnp.float32), shift.astype(jnp.float32)

    # TODO(synk): PyTorch's default module state is train-mode BN (batch
    # statistics); we fold eval-mode running statistics (inference form).
    s1, b1 = fold_bn(*params['bn1'])
    s2, b2 = fold_bn(*params['bn2'])
    s3, b3 = fold_bn(*params['bn3'])

    def prep_w(w, scale):
        # OIHW conv weight -> (cout, 9*cin) matmul matrix with the BN scale
        # folded in; column order (kh*3 + kw)*cin + ci matches im2col rows.
        cout, cin = w.shape[0], w.shape[1]
        w = w.astype(jnp.float32) * scale[:, None, None, None]
        return jnp.transpose(w, (0, 2, 3, 1)).reshape(cout, 9 * cin)

    w1 = prep_w(params['w1'], s1).astype(mxu_dtype)              # (C, 9*C*C)
    wab = jnp.concatenate([prep_w(params['w2'], s2),
                           prep_w(params['w3'], s3)],
                          axis=0).astype(mxu_dtype)              # (2C, 9*C)
    b1 = b1.reshape(C, 1)
    bab = jnp.concatenate([b2, b3], axis=0).reshape(2 * C, 1)

    # Zero-pad the spatial halo, flatten, pad lanes to Lpad, pack Nb per group.
    def pad_pack(x):
        xp = jnp.pad(x.astype(jnp.float32), ((0, 0), (0, 0), (1, 1), (1, 1)))
        xp = xp.reshape(N, C, Lp)
        xp = jnp.pad(xp, ((0, 0), (0, 0), (0, Lpad - Lp)))
        return xp.reshape(G, Nb, C, Lpad).transpose(0, 2, 1, 3).reshape(G, C, L)

    x1p = pad_pack(x1)
    x2p = pad_pack(x2)

    # Interior (non-halo, non-pad) mask over the packed lane axis.
    rows = jnp.arange(H + 2)
    cols = jnp.arange(W + 2)
    m2d = (((rows >= 1) & (rows <= H))[:, None]
           & ((cols >= 1) & (cols <= W))[None, :]).astype(jnp.float32)
    mseg = jnp.pad(m2d.reshape(Lp), (0, Lpad - Lp))
    mask = jnp.tile(mseg, (Nb,)).reshape(1, L)

    kernel = functools.partial(_channel_attention_kernel, W=W,
                               mxu_dtype=mxu_dtype)

    flops = int(G * L * (2 * C * 9 * CC + 2 * (2 * C) * (9 * C) + 3 * CC))
    bytes_accessed = int(4 * 3 * G * C * L + 2 * (w1.size + wab.size)
                         + 4 * (3 * C + L))
    cost = pl.CostEstimate(flops=flops, transcendentals=0,
                           bytes_accessed=bytes_accessed)

    out_p = pl.pallas_call(
        kernel,
        out_shape=jax.ShapeDtypeStruct((G, C, L), x1.dtype),
        grid_spec=pltpu.PrefetchScalarGridSpec(
            num_scalar_prefetch=0,
            grid=(G,),
            in_specs=[
                pl.BlockSpec((1, C, L), lambda n: (n, 0, 0)),
                pl.BlockSpec((1, C, L), lambda n: (n, 0, 0)),
                pl.BlockSpec((C, 9 * CC), lambda n: (0, 0)),
                pl.BlockSpec((2 * C, 9 * C), lambda n: (0, 0)),
                pl.BlockSpec((C, 1), lambda n: (0, 0)),
                pl.BlockSpec((2 * C, 1), lambda n: (0, 0)),
                pl.BlockSpec((1, L), lambda n: (0, 0)),
            ],
            out_specs=pl.BlockSpec((1, C, L), lambda n: (n, 0, 0)),
        ),
        compiler_params=pltpu.CompilerParams(
            dimension_semantics=("parallel",),
            vmem_limit_bytes=48 * 1024 * 1024),
        cost_estimate=cost,
    )(x1p, x2p, w1, wab, b1, bab, mask)

    # Unpack lanes -> (N, C, H+2, W+2), crop the 1-pixel halo (already NCHW).
    out = (out_p.reshape(G, C, Nb, Lpad).transpose(0, 2, 1, 3)
           .reshape(N, C, Lpad)[:, :, :Lp]
           .reshape(N, C, H + 2, W + 2)[:, :, 1:H + 1, 1:W + 1])
    return out


def _reference(x1, x2, params):
    """Pure-JAX f32 reference matching the PyTorch forward (BN in eval mode)."""
    N, C, H, W = x1.shape
    c = jnp.einsum('nihw,njhw->nijhw', x1, x2).reshape(N, C * C, H, W)

    def conv_bn(x, w, bn):
        gamma, beta, mean, var = bn
        y = jax.lax.conv_general_dilated(
            x, w, window_strides=(1, 1), padding=((1, 1), (1, 1)),
            dimension_numbers=('NCHW', 'OIHW', 'NCHW'))
        inv = gamma / jnp.sqrt(var + 1e-5)
        return y * inv[None, :, None, None] + (beta - mean * inv)[None, :, None, None]

    c_ = conv_bn(c, params['w1'], params['bn1'])
    alpha = conv_bn(c_, params['w2'], params['bn2'])
    beta_ = conv_bn(c_, params['w3'], params['bn3'])
    return alpha * x1 + beta_ + x2


if __name__ == "__main__":
    N, C, H, W = 2, 4, 16, 16
    CC = C * C
    keys = jax.random.split(jax.random.PRNGKey(0), 16)

    x1 = jax.random.normal(keys[0], (N, C, H, W), jnp.float32)
    x2 = jax.random.normal(keys[1], (N, C, H, W), jnp.float32)

    def bn_params(k):
        ka, kb, kc, kd = jax.random.split(k, 4)
        gamma = 1.0 + 0.1 * jax.random.normal(ka, (C,), jnp.float32)
        beta = 0.1 * jax.random.normal(kb, (C,), jnp.float32)
        mean = 0.1 * jax.random.normal(kc, (C,), jnp.float32)
        var = 0.5 + jax.random.uniform(kd, (C,), jnp.float32)
        return (gamma, beta, mean, var)

    params = {
        'w1': 0.1 * jax.random.normal(keys[2], (C, CC, 3, 3), jnp.float32),
        'w2': 0.1 * jax.random.normal(keys[3], (C, C, 3, 3), jnp.float32),
        'w3': 0.1 * jax.random.normal(keys[4], (C, C, 3, 3), jnp.float32),
        'bn1': bn_params(keys[5]),
        'bn2': bn_params(keys[6]),
        'bn3': bn_params(keys[7]),
    }

    out = channel_attention(x1, x2, params)
    out = jax.block_until_ready(out)

    ref = _reference(x1, x2, params)
    # bf16 MXU operands (f32 accumulation / epilogue): loosened tolerance.
    np.testing.assert_allclose(np.asarray(out), np.asarray(ref),
                               rtol=3e-2, atol=3e-2)
    print("KERNEL_OK")
</pallas_src>

<mosaic_0001>
module attributes {stable_mosaic.version = 11 : i64} {
  func.func @_channel_attention_kernel(%arg0: i32, %arg1: memref<1x4x768xf32, #tpu.memory_space<vmem>>, %arg2: memref<1x4x768xf32, #tpu.memory_space<vmem>>, %arg3: memref<4x144xbf16, #tpu.memory_space<vmem>>, %arg4: memref<8x36xbf16, #tpu.memory_space<vmem>>, %arg5: memref<4x1xf32, #tpu.memory_space<vmem>>, %arg6: memref<8x1xf32, #tpu.memory_space<vmem>>, %arg7: memref<1x768xf32, #tpu.memory_space<vmem>>, %arg8: memref<1x4x768xf32, #tpu.memory_space<vmem>>) attributes {dimension_semantics = [#tpu.dimension_semantics<parallel>], iteration_bounds = array<i64: 1>, scalar_prefetch = 0 : i64, scratch_operands = 0 : i64, tpu.core_type = #tpu.core_type<tc>, window_params = [{transform_indices = @transform_0, window_bounds = array<i64: 1, 4, 768>}, {transform_indices = @transform_1, window_bounds = array<i64: 1, 4, 768>}, {pipeline_mode = #tpu.pipeline_mode<synchronous>, transform_indices = @transform_2, window_bounds = array<i64: 4, 144>}, {pipeline_mode = #tpu.pipeline_mode<synchronous>, transform_indices = @transform_3, window_bounds = array<i64: 8, 36>}, {pipeline_mode = #tpu.pipeline_mode<synchronous>, transform_indices = @transform_4, window_bounds = array<i64: 4, 1>}, {pipeline_mode = #tpu.pipeline_mode<synchronous>, transform_indices = @transform_5, window_bounds = array<i64: 8, 1>}, {pipeline_mode = #tpu.pipeline_mode<synchronous>, transform_indices = @transform_6, window_bounds = array<i64: 1, 768>}, {transform_indices = @transform_7, window_bounds = array<i64: 1, 4, 768>}]} {
    %c0 = arith.constant 0 : index
    %c0_0 = arith.constant 0 : index
    %c0_1 = arith.constant 0 : index
    %0 = vector.load %arg1[%c0, %c0_0, %c0_1] : memref<1x4x768xf32, #tpu.memory_space<vmem>>, vector<1x4x768xf32>
    %1 = vector.shape_cast %0 : vector<1x4x768xf32> to vector<4x768xf32>
    %c0_2 = arith.constant 0 : index
    %c0_3 = arith.constant 0 : index
    %c0_4 = arith.constant 0 : index
    %2 = vector.load %arg2[%c0_2, %c0_3, %c0_4] : memref<1x4x768xf32, #tpu.memory_space<vmem>>, vector<1x4x768xf32>
    %3 = vector.shape_cast %2 : vector<1x4x768xf32> to vector<4x768xf32>
    %4 = vector.extract_strided_slice %1 {offsets = [0, 0], sizes = [1, 768], strides = [1, 1]} : vector<4x768xf32> to vector<1x768xf32>
    %5 = vector.broadcast %4 : vector<1x768xf32> to vector<4x768xf32>
    %6 = arith.mulf %5, %3 : vector<4x768xf32>
    %7 = vector.extract_strided_slice %1 {offsets = [1, 0], sizes = [1, 768], strides = [1, 1]} : vector<4x768xf32> to vector<1x768xf32>
    %8 = vector.broadcast %7 : vector<1x768xf32> to vector<4x768xf32>
    %9 = arith.mulf %8, %3 : vector<4x768xf32>
    %10 = vector.extract_strided_slice %1 {offsets = [2, 0], sizes = [1, 768], strides = [1, 1]} : vector<4x768xf32> to vector<1x768xf32>
    %11 = vector.broadcast %10 : vector<1x768xf32> to vector<4x768xf32>
    %12 = arith.mulf %11, %3 : vector<4x768xf32>
    %13 = vector.extract_strided_slice %1 {offsets = [3, 0], sizes = [1, 768], strides = [1, 1]} : vector<4x768xf32> to vector<1x768xf32>
    %14 = vector.broadcast %13 : vector<1x768xf32> to vector<4x768xf32>
    %15 = arith.mulf %14, %3 : vector<4x768xf32>
    %16 = tpu.concatenate %6, %9, %12, %15 in 0 : vector<4x768xf32>, vector<4x768xf32>, vector<4x768xf32>, vector<4x768xf32> -> vector<16x768xf32>
    %c0_5 = arith.constant 0 : index
    %c0_6 = arith.constant 0 : index
    %17 = vector.load %arg7[%c0_5, %c0_6] : memref<1x768xf32, #tpu.memory_space<vmem>>, vector<1x768xf32>
    %c0_7 = arith.constant 0 : index
    %c0_8 = arith.constant 0 : index
    %18 = vector.load %arg3[%c0_7, %c0_8] : memref<4x144xbf16, #tpu.memory_space<vmem>>, vector<4x144xbf16>
    %c19_i32 = arith.constant 19 : i32
    %19 = tpu.dynamic_rotate %16 by %c19_i32 dim 1 : vector<16x768xf32>, i32 -> vector<16x768xf32>
    %c18_i32 = arith.constant 18 : i32
    %20 = tpu.dynamic_rotate %16 by %c18_i32 dim 1 : vector<16x768xf32>, i32 -> vector<16x768xf32>
    %c17_i32 = arith.constant 17 : i32
    %21 = tpu.dynamic_rotate %16 by %c17_i32 dim 1 : vector<16x768xf32>, i32 -> vector<16x768xf32>
    %c1_i32 = arith.constant 1 : i32
    %22 = tpu.dynamic_rotate %16 by %c1_i32 dim 1 : vector<16x768xf32>, i32 -> vector<16x768xf32>
    %c767_i32 = arith.constant 767 : i32
    %23 = tpu.dynamic_rotate %16 by %c767_i32 dim 1 : vector<16x768xf32>, i32 -> vector<16x768xf32>
    %c751_i32 = arith.constant 751 : i32
    %24 = tpu.dynamic_rotate %16 by %c751_i32 dim 1 : vector<16x768xf32>, i32 -> vector<16x768xf32>
    %c750_i32 = arith.constant 750 : i32
    %25 = tpu.dynamic_rotate %16 by %c750_i32 dim 1 : vector<16x768xf32>, i32 -> vector<16x768xf32>
    %c749_i32 = arith.constant 749 : i32
    %26 = tpu.dynamic_rotate %16 by %c749_i32 dim 1 : vector<16x768xf32>, i32 -> vector<16x768xf32>
    %27 = tpu.concatenate %19, %20, %21, %22, %16, %23, %24, %25, %26 in 0 : vector<16x768xf32>, vector<16x768xf32>, vector<16x768xf32>, vector<16x768xf32>, vector<16x768xf32>, vector<16x768xf32>, vector<16x768xf32>, vector<16x768xf32>, vector<16x768xf32> -> vector<144x768xf32>
    %28 = arith.truncf %27 : vector<144x768xf32> to vector<144x768xbf16>
    %cst = arith.constant dense<0.000000e+00> : vector<4x768xf32>
    %29 = tpu.matmul %18, %28, %cst {dimension_numbers = #tpu.dot_dimension_numbers<[1], [0], [0], [1], [0, 0, 1, 1], [], []>} : vector<4x144xbf16>, vector<144x768xbf16>, vector<4x768xf32> -> vector<4x768xf32>
    %c0_9 = arith.constant 0 : index
    %c0_10 = arith.constant 0 : index
    %30 = vector.load %arg5[%c0_9, %c0_10] : memref<4x1xf32, #tpu.memory_space<vmem>>, vector<4x1xf32>
    %31 = vector.broadcast %30 : vector<4x1xf32> to vector<4x768xf32>
    %32 = arith.addf %29, %31 : vector<4x768xf32>
    %33 = vector.broadcast %17 : vector<1x768xf32> to vector<4x768xf32>
    %34 = arith.mulf %32, %33 : vector<4x768xf32>
    %c0_11 = arith.constant 0 : index
    %c0_12 = arith.constant 0 : index
    %35 = vector.load %arg4[%c0_11, %c0_12] : memref<8x36xbf16, #tpu.memory_space<vmem>>, vector<8x36xbf16>
    %c19_i32_13 = arith.constant 19 : i32
    %36 = tpu.dynamic_rotate %34 by %c19_i32_13 dim 1 : vector<4x768xf32>, i32 -> vector<4x768xf32>
    %c18_i32_14 = arith.constant 18 : i32
    %37 = tpu.dynamic_rotate %34 by %c18_i32_14 dim 1 : vector<4x768xf32>, i32 -> vector<4x768xf32>
    %c17_i32_15 = arith.constant 17 : i32
    %38 = tpu.dynamic_rotate %34 by %c17_i32_15 dim 1 : vector<4x768xf32>, i32 -> vector<4x768xf32>
    %c1_i32_16 = arith.constant 1 : i32
    %39 = tpu.dynamic_rotate %34 by %c1_i32_16 dim 1 : vector<4x768xf32>, i32 -> vector<4x768xf32>
    %c767_i32_17 = arith.constant 767 : i32
    %40 = tpu.dynamic_rotate %34 by %c767_i32_17 dim 1 : vector<4x768xf32>, i32 -> vector<4x768xf32>
    %c751_i32_18 = arith.constant 751 : i32
    %41 = tpu.dynamic_rotate %34 by %c751_i32_18 dim 1 : vector<4x768xf32>, i32 -> vector<4x768xf32>
    %c750_i32_19 = arith.constant 750 : i32
    %42 = tpu.dynamic_rotate %34 by %c750_i32_19 dim 1 : vector<4x768xf32>, i32 -> vector<4x768xf32>
    %c749_i32_20 = arith.constant 749 : i32
    %43 = tpu.dynamic_rotate %34 by %c749_i32_20 dim 1 : vector<4x768xf32>, i32 -> vector<4x768xf32>
    %44 = tpu.concatenate %36, %37, %38, %39, %34, %40, %41, %42, %43 in 0 : vector<4x768xf32>, vector<4x768xf32>, vector<4x768xf32>, vector<4x768xf32>, vector<4x768xf32>, vector<4x768xf32>, vector<4x768xf32>, vector<4x768xf32>, vector<4x768xf32> -> vector<36x768xf32>
    %45 = arith.truncf %44 : vector<36x768xf32> to vector<36x768xbf16>
    %cst_21 = arith.constant dense<0.000000e+00> : vector<8x768xf32>
    %46 = tpu.matmul %35, %45, %cst_21 {dimension_numbers = #tpu.dot_dimension_numbers<[1], [0], [0], [1], [0, 0, 1, 1], [], []>} : vector<8x36xbf16>, vector<36x768xbf16>, vector<8x768xf32> -> vector<8x768xf32>
    %c0_22 = arith.constant 0 : index
    %c0_23 = arith.constant 0 : index
    %47 = vector.load %arg6[%c0_22, %c0_23] : memref<8x1xf32, #tpu.memory_space<vmem>>, vector<8x1xf32>
    %48 = vector.broadcast %47 : vector<8x1xf32> to vector<8x768xf32>
    %49 = arith.addf %46, %48 : vector<8x768xf32>
    %50 = vector.extract_strided_slice %49 {offsets = [0, 0], sizes = [4, 768], strides = [1, 1]} : vector<8x768xf32> to vector<4x768xf32>
    %51 = arith.mulf %50, %1 : vector<4x768xf32>
    %52 = vector.extract_strided_slice %49 {offsets = [4, 0], sizes = [4, 768], strides = [1, 1]} : vector<8x768xf32> to vector<4x768xf32>
    %53 = arith.addf %51, %52 : vector<4x768xf32>
    %54 = arith.addf %53, %3 : vector<4x768xf32>
    %c0_24 = arith.constant 0 : index
    %c0_25 = arith.constant 0 : index
    %c0_26 = arith.constant 0 : index
    %55 = vector.load %arg8[%c0_24, %c0_25, %c0_26] : memref<1x4x768xf32, #tpu.memory_space<vmem>>, vector<1x4x768xf32>
    %56 = vector.shape_cast %55 : vector<1x4x768xf32> to vector<4x768xf32>
    %57 = vector.shape_cast %54 : vector<4x768xf32> to vector<1x4x768xf32>
    tpu.vector_store %arg8[%c0_24, %c0_25, %c0_26], %57 {strides = array<i32>} : memref<1x4x768xf32, #tpu.memory_space<vmem>>, vector<1x4x768xf32>,
    return
  }
  func.func @transform_0(%arg0: i32) -> (i32, i32, i32) {
    %c0_i32 = arith.constant 0 : i32
    %c0_i32_0 = arith.constant 0 : i32
    %c0_i32_1 = arith.constant 0 : i32
    return %arg0, %c0_i32, %c0_i32_0 : i32, i32, i32
  }
  func.func @transform_1(%arg0: i32) -> (i32, i32, i32) {
    %c0_i32 = arith.constant 0 : i32
    %c0_i32_0 = arith.constant 0 : i32
    %c0_i32_1 = arith.constant 0 : i32
    return %arg0, %c0_i32, %c0_i32_0 : i32, i32, i32
  }
  func.func @transform_2(%arg0: i32) -> (i32, i32) {
    %c0_i32 = arith.constant 0 : i32
    %c0_i32_0 = arith.constant 0 : i32
    %c0_i32_1 = arith.constant 0 : i32
    return %c0_i32, %c0_i32_0 : i32, i32
  }
  func.func @transform_3(%arg0: i32) -> (i32, i32) {
    %c0_i32 = arith.constant 0 : i32
    %c0_i32_0 = arith.constant 0 : i32
    %c0_i32_1 = arith.constant 0 : i32
    return %c0_i32, %c0_i32_0 : i32, i32
  }
  func.func @transform_4(%arg0: i32) -> (i32, i32) {
    %c0_i32 = arith.constant 0 : i32
    %c0_i32_0 = arith.constant 0 : i32
    %c0_i32_1 = arith.constant 0 : i32
    return %c0_i32, %c0_i32_0 : i32, i32
  }
  func.func @transform_5(%arg0: i32) -> (i32, i32) {
    %c0_i32 = arith.constant 0 : i32
    %c0_i32_0 = arith.constant 0 : i32
    %c0_i32_1 = arith.constant 0 : i32
    return %c0_i32, %c0_i32_0 : i32, i32
  }
  func.func @transform_6(%arg0: i32) -> (i32, i32) {
    %c0_i32 = arith.constant 0 : i32
    %c0_i32_0 = arith.constant 0 : i32
    %c0_i32_1 = arith.constant 0 : i32
    return %c0_i32, %c0_i32_0 : i32, i32
  }
  func.func @transform_7(%arg0: i32) -> (i32, i32, i32) {
    %c0_i32 = arith.constant 0 : i32
    %c0_i32_0 = arith.constant 0 : i32
    %c0_i32_1 = arith.constant 0 : i32
    return %arg0, %c0_i32, %c0_i32_0 : i32, i32, i32
  }
}

</mosaic_0001>

<bundles_post_ra>
// kernel: tpu_custom_call.1
= control target key start
LH: loop header
LB: loop body
LE: loop exit
PB: predicated region body
PF: predicated region fallthrough
CT: control target
= control target key end

     0   :  { %12 = vsyncpa [#allocation3], 0  ;;  %s2871_s0 = inlined_call_operand.hbm [shape: f32[1,4,768], index: 0, kind: input, shape index: {}]   ;;  %s2872_s1 = inlined_call_operand.hbm [shape: f32[1,4,768], index: 1, kind: input, shape index: {}]   ;;  %s2873_s2 = inlined_call_operand.vmem [shape: bf16[4,144], index: 2, kind: input, shape index: {}]   ;;  %s2874_s3 = inlined_call_operand.vmem [shape: bf16[8,36], index: 3, kind: input, shape index: {}]   ;;  %s2875_s4 = inlined_call_operand.vmem [shape: f32[4,1], index: 4, kind: input, shape index: {}]   ;;  %s2876_s5 = inlined_call_operand.vmem [shape: f32[8,1], index: 5, kind: input, shape index: {}]   ;;  %s2877_s6 = inlined_call_operand.vmem [shape: f32[1,768], index: 6, kind: input, shape index: {}]   ;;  %s2878_s7 = inlined_call_operand.hbm [shape: f32[1,4,768], index: 7, kind: output, shape index: {}]  }
   0x1   :  { %13 = vsyncpa [#allocation6], 0 }
   0x2   :  { %14 = vsyncpa [#allocation4], 0  ;;  %s20_s26 = sshll.u32 %s2871_s0, 4  ;;  %s1754_s27 = smov [#allocation2]   ;;  %s21_s26 = int_to_ptr.hbm [resolvable:$true] %s20_s26 }
   0x3   :  { %s22_s28 = sshll.u32 %s1754_s27, 4  ;;  %s31_s8 = sshll.u32 %s2872_s1, 4  ;;  %s23_s28 = int_to_ptr.vmem [resolvable:$true] %s22_s28  ;;  %s32_s8 = int_to_ptr.hbm [resolvable:$true] %s31_s8 }
   0x4   :  { %25 = dma.hbm_to_vmem [thread:$0]  %s21_s26, 384, %s23_s28, [#allocation3]  }
   0x5   :  { %s1755_s9 = smov [#allocation5]  }
   0x6   :  { %s33_s10 = sshll.u32 %s1755_s9, 4  ;;  %s34_s10 = int_to_ptr.vmem [resolvable:$true] %s33_s10 }
   0x7   :  { %36 = dma.hbm_to_vmem [thread:$0]  %s32_s8, 384, %s34_s10, [#allocation6]  }
   0x8   :  { %1748 = dma.done.wait [#allocation3], 384  }
   0x9   :  { %1749 = vsyncadd [#allocation3], 4294966912 }
   0xa   :  { %1750 = dma.done.wait [#allocation6], 384  }
   0xb   :  { %1751 = vsyncadd [#allocation6], 4294966912  ;;  %v1812_v0 = vld [vmem:[#allocation5 + $0x8] sm:$0xff]  ;;  %v1815_v1 = vld [vmem:[#allocation5] sm:$0xff]  ;;  %vm268_vm0 = vcmask 1043456   ;;  %s1756_s0 = smov 110  }
   0xc   :  { %88 = vst [vmem:[#allocation1 + $0x10] ss:$2 sm:$0xff] %v1812_v0  ;;  %v1826_v6 = vld [vmem:[#allocation5 + $0x10] sm:$0xff]  ;;  %v1831_v8 = vld [vmem:[#allocation2] sm:$0xff]  ;;  %s1757_s1 = smov 111   ;;  %s1758_s11 = smov 127  }
   0xd   :  { %86 = vst [vmem:[#allocation1] ss:$2 sm:$0xff] %v1815_v1  ;;  %v1829_v7 = vld [vmem:[#allocation2 + $0x8] sm:$0xff]  ;;  %v65_v17 = vperm.slane %v1831_v8, 0  ;;  %v109_v18 = vperm.slane %v1831_v8, 1  ;;  %v150_v19 = vperm.slane %v1831_v8, 2 }
   0xe   :  { %90 = vst [vmem:[#allocation1 + $0x20] ss:$2 sm:$0xff] %v1826_v6  ;;  %v67_v11 = vperm.slane %v1829_v7, 0  ;;  %v111_v12 = vperm.slane %v1829_v7, 1  ;;  %v152_v13 = vperm.slane %v1829_v7, 2  ;;  %v193_v14 = vperm.slane %v1829_v7, 3 }
   0xf   :  { %v191_v22 = vperm.slane %v1831_v8, 3  ;;  %v112_v23 = vperm.slane %v1829_v7, 5  ;;  %v77_v28 = vperm.slane %v65_v17, 0  ;;  %v121_v29 = vperm.slane %v109_v18, 1  ;;  %s1759_s12 = smov 109   ;;  %s1760_s13 = smov 1  }
  0x10   :  { %v79_v24 = vperm.slane %v67_v11, 0  ;;  %v123_v25 = vperm.slane %v111_v12, 1  ;;  %v164_v26 = vperm.slane %v152_v13, 2  ;;  %v205_v27 = vperm.slane %v193_v14, 3  ;;  %s1761_s14 = smov 17   ;;  %s1762_s15 = smov 18  }
  0x11   :  { %v162_v30 = vperm.slane %v150_v19, 2  ;;  %v194_v31 = vperm.slane %v1829_v7, 7  ;;  %v68_v34 = vperm.slane %v1829_v7, 4  ;;  %v124_v35 = vperm.slane %v112_v23, 1  ;;  %s1763_s16 = smov 19   ;;  %s1285_s26 = sshll.u32 %s2878_s7, 4  ;;  %s1286_s26 = int_to_ptr.hbm [resolvable:$true] %s1285_s26 }
  0x12   :  { %v153_v36 = vperm.slane %v1829_v7, 6  ;;  %v110_v37 = vperm.slane %v1831_v8, 5  ;;  %v66_v42 = vperm.slane %v1831_v8, 4  ;;  %v151_v43 = vperm.slane %v1831_v8, 6 }
  0x13   :  { %v93_v2 = vld.sshfl [vmem:[#allocation1 + $0x10] sm:$0xff pattern:$0x75316420]  ;;  %v1818_v3 = vld.sshfl [vmem:[#allocation1 + $0x18] sm:$0xff pattern:$0x75316420] }
  0x14   :  { %129 = vst [vmem:[#allocation1 + $0x10] ss:$2 sm:$0xff] %v1812_v0  ;;  %v1821_v4 = vld.sshfl [vmem:[#allocation1] sm:$0xff pattern:$0x75316420]  ;;  %v192_v44 = vperm.slane %v1831_v8, 7  ;;  %v105_v47 = vmul.f32 %v93_v2, %v79_v24 }
  0x15   :  { %v1823_v5 = vld.sshfl [vmem:[#allocation1 + $0x8] sm:$0xff pattern:$0x75316420]  ;;  %v1842_v20 = vld.sshfl [vmem:[#allocation1 + $0x20] sm:$0xff pattern:$0x75316420]  ;;  %v103_v60 = vmul.f32 %v1821_v4, %v77_v28 }
  0x16   :  { %127 = vst [vmem:[#allocation1] ss:$2 sm:$0xff] %v1815_v1  ;;  %v1844_v21 = vld.sshfl [vmem:[#allocation1 + $0x28] sm:$0xff pattern:$0x75316420]  ;;  %v203_v48 = vperm.slane %v191_v22, 3 }
  0x17   :  { %131 = vst [vmem:[#allocation1 + $0x20] ss:$2 sm:$0xff] %v1826_v6  ;;  %v206_v50 = vperm.slane %v194_v31, 3  ;;  %v80_v52 = vperm.slane %v68_v34, 0  ;;  %v165_v53 = vperm.slane %v153_v36, 2  ;;  %v122_v54 = vperm.slane %v110_v37, 1 }
  0x18   :  { %v78_v56 = vperm.slane %v66_v42, 0  ;;  %v163_v57 = vperm.slane %v151_v43, 2  ;;  %v204_v58 = vperm.slane %v192_v44, 3  ;;  %vm646_vm8 = vcmask 130048  }
  0x19   :  { %v106_v4 = vmul.f32 %v1818_v3, %v80_v52  ;;  %vm1093_vm10 = vcmask 1041408   ;;  %vm1089_vm11 = vcmask 293888  }
  0x1a   :  { %v104_v28 = vmul.f32 %v1823_v5, %v78_v56 }
  0x1b   :  { %v134_v9 = vld.sshfl [vmem:[#allocation1 + $0x10] sm:$0xff pattern:$0x75316420]  ;;  %v135_v10 = vld.sshfl [vmem:[#allocation1 + $0x18] sm:$0xff pattern:$0x75316420] }
  0x1c   :  { %170 = vst [vmem:[#allocation1 + $0x10] ss:$2 sm:$0xff] %v1812_v0  ;;  %v146_v38 = vmul.f32 %v134_v9, %v123_v25  ;;  %v147_v49 = vmul.f32 %v135_v10, %v124_v35 }
  0x1d   :  { %v132_v15 = vld.sshfl [vmem:[#allocation1] sm:$0xff pattern:$0x75316420]  ;;  %v133_v16 = vld.sshfl [vmem:[#allocation1 + $0x8] sm:$0xff pattern:$0x75316420] }
  0x1e   :  { %168 = vst [vmem:[#allocation1] ss:$2 sm:$0xff] %v1815_v1  ;;  %v144_v41 = vmul.f32 %v132_v15, %v121_v29  ;;  %v1858_v45 = vld.sshfl [vmem:[#allocation1 + $0x20] sm:$0xff pattern:$0x75316420]  ;;  %v240_v51 = vrot.slane %v146_v38, 4  ;;  %v145_v12 = vmul.f32 %v133_v16, %v122_v54 }
  0x1f   :  { %v1860_v46 = vld.sshfl [vmem:[#allocation1 + $0x28] sm:$0xff pattern:$0x75316420]  ;;  %v241_v9 = vrot.slane %v147_v49, 4  ;;  %v58_v38 = vld [vmem:[#allocation2 + $0x10] sm:$0xff] }
  0x20   :  { %172 = vst [vmem:[#allocation1 + $0x20] ss:$2 sm:$0xff] %v1826_v6  ;;  %v238_v55 = vrot.slane %v144_v41, 4  ;;  %v1865_v10 = vsel %vm268_vm0, %v105_v47, %v240_v51  ;;  %v70_v41 = vperm.slane %v58_v38, 4  ;;  %v155_v43 = vperm.slane %v58_v38, 6 }
  0x22   :  { %v1868_v19 = vsel %vm268_vm0, %v103_v60, %v238_v55  ;;  %v69_v60 = vperm.slane %v58_v38, 0 }
  0x23   :  { %v175_v32 = vld.sshfl [vmem:[#allocation1 + $0x10] sm:$0xff pattern:$0x75316420]  ;;  %v176_v33 = vld.sshfl [vmem:[#allocation1 + $0x18] sm:$0xff pattern:$0x75316420] }
  0x24   :  { %211 = vst [vmem:[#allocation1 + $0x10] ss:$2 sm:$0xff] %v1812_v0  ;;  %v187_v62 = vmul.f32 %v175_v32, %v164_v26  ;;  %v188_v26 = vmul.f32 %v176_v33, %v165_v53  ;;  %v1890_v33 = vsel %vm268_vm0, %v106_v4, %v241_v9 }
  0x25   :  { %v173_v39 = vld.sshfl [vmem:[#allocation1] sm:$0xff pattern:$0x75316420]  ;;  %v174_v40 = vld.sshfl [vmem:[#allocation1 + $0x8] sm:$0xff pattern:$0x75316420] }
  0x26   :  { %209 = vst [vmem:[#allocation1] ss:$2 sm:$0xff] %v1815_v1  ;;  %v185_v15 = vmul.f32 %v173_v39, %v162_v30  ;;  %v186_v3 = vmul.f32 %v174_v40, %v163_v57  ;;  %v239_v30 = vrot.slane %v145_v12, 4  ;;  %v114_v39 = vperm.slane %v58_v38, 5 }
  0x27   :  { %v1871_v22 = vld.sshfl [vmem:[#allocation1 + $0x20] sm:$0xff pattern:$0x75316420]  ;;  %v178_v23 = vld.sshfl [vmem:[#allocation1 + $0x28] sm:$0xff pattern:$0x75316420] }
  0x28   :  { %213 = vst [vmem:[#allocation1 + $0x20] ss:$2 sm:$0xff] %v1826_v6  ;;  %v1898_v5 = vsel %vm268_vm0, %v104_v28, %v239_v30  ;;  %v196_v40 = vperm.slane %v58_v38, 7  ;;  %v126_v42 = vperm.slane %v114_v39, 1 }
  0x2a   :  { %v208_v44 = vperm.slane %v196_v40, 3  ;;  %v149_v49 = vmul.f32 %v1860_v46, %v126_v42 }
  0x2b   :  { %v216_v59 = vld.sshfl [vmem:[#allocation1 + $0x10] sm:$0xff pattern:$0x75316420]  ;;  %v217_v61 = vld.sshfl [vmem:[#allocation1 + $0x18] sm:$0xff pattern:$0x75316420] }
  0x2c   :  { %v228_v63 = vmul.f32 %v216_v59, %v205_v27  ;;  %v229_v2 = vmul.f32 %v217_v61, %v206_v50  ;;  %v167_v50 = vperm.slane %v155_v43, 2  ;;  %v243_v54 = vrot.slane %v149_v49, 4 }
  0x2d   :  { %v214_v11 = vld.sshfl [vmem:[#allocation1] sm:$0xff pattern:$0x75316420]  ;;  %v215_v13 = vld.sshfl [vmem:[#allocation1 + $0x8] sm:$0xff pattern:$0x75316420] }
  0x2e   :  { %v258_v14 = vrot.slane %v228_v63, 4  ;;  %v226_v17 = vmul.f32 %v214_v11, %v203_v48  ;;  %v227_v18 = vmul.f32 %v215_v13, %v204_v58  ;;  %v259_v27 = vrot.slane %v229_v2, 4 }
  0x2f   :  { %v219_v47 = vld.sshfl [vmem:[#allocation1 + $0x28] sm:$0xff pattern:$0x75316420]  ;;  %v82_v48 = vperm.slane %v70_v41, 0  ;;  %v190_v53 = vmul.f32 %v178_v23, %v167_v50  ;;  %v113_v58 = vperm.slane %v58_v38, 1  ;;  %v195_v59 = vperm.slane %v58_v38, 3 }
  0x30   :  { %v1874_v24 = vsel %vm268_vm0, %v187_v62, %v258_v14  ;;  %v256_v25 = vrot.slane %v226_v17, 4  ;;  %v257_v31 = vrot.slane %v227_v18, 4  ;;  %v1893_v34 = vsel %vm268_vm0, %v188_v26, %v259_v27  ;;  %v218_v57 = vld.sshfl [vmem:[#allocation1 + $0x20] sm:$0xff pattern:$0x75316420] }
  0x31   :  { %v1879_v16 = vpack.i.bf16 %v1874_v24, %v1865_v10  ;;  %v1905_v36 = vpack.i.bf16 %v1893_v34, %v1890_v33  ;;  %v231_v51 = vmul.f32 %v219_v47, %v208_v44  ;;  %v108_v52 = vmul.f32 %v1844_v21, %v82_v48  ;;  %1194 = vst [vmem:[#allocation1 + $0x20] ss:$2 sm:$0xff] %v58_v38 }
  0x32   :  { %v1883_v29 = vsel %vm268_vm0, %v185_v15, %v256_v25  ;;  %v1901_v35 = vsel %vm268_vm0, %v186_v3, %v257_v31  ;;  %v125_v61 = vperm.slane %v113_v58, 1  ;;  %v154_v62 = vperm.slane %v58_v38, 2 }
  0x33   :  { %1331 = vrot.lane.b32.xlu1 %v1879_v16, %s1756_s0  ;;  %v1340_v32 = vpack.i.bf16 %v1883_v29, %v1868_v19  ;;  %v1345_v37 = vpack.i.bf16 %v1901_v35, %v1898_v5  ;;  %v261_v55 = vrot.slane %v231_v51, 4  ;;  %v1929_v56 = vsel %vm268_vm0, %v108_v52, %v243_v54 }
  0x34   :  { %v207_v63 = vperm.slane %v195_v59, 3  ;;  %v81_v2 = vperm.slane %v69_v60, 0  ;;  %v148_v9 = vmul.f32 %v1858_v45, %v125_v61  ;;  %v166_v11 = vperm.slane %v154_v62, 2 }
  0x35   :  { %1341 = vrot.lane.b32.xlu2 %v1340_v32, %s1757_s1  ;;  %1321 = vrot.lane.b32.xlu0 %v1340_v32, %s1756_s0  ;;  %v1932_v46 = vsel %vm268_vm0, %v190_v53, %v261_v55 }
  0x36   :  { %v1395_v21 = vpack.i.bf16 %v1932_v46, %v1929_v56  ;;  %v230_v12 = vmul.f32 %v218_v57, %v207_v63  ;;  %v107_v13 = vmul.f32 %v1842_v20, %v81_v2  ;;  %v189_v14 = vmul.f32 %v1871_v22, %v166_v11 }
  0x37   :  { %v242_v15 = vrot.slane %v148_v9, 4 }
  0x38   :  { %v260_v17 = vrot.slane %v230_v12, 4 }
  0x39   :  { %v1963_v18 = vsel %vm268_vm0, %v107_v13, %v242_v15 }
  0x3a   :  { %v1966_v45 = vsel %vm268_vm0, %v189_v14, %v260_v17 }
  0x3b   :  { %1336 = vrot.lane.b32.xlu1 %v1905_v36, %s1756_s0  ;;  %v1495_v20 = vpack.i.bf16 %v1966_v45, %v1963_v18 }
  0x3d   :  { %1346 = vrot.lane.b32.xlu2 %v1345_v37, %s1757_s1  ;;  %1326 = vrot.lane.b32.xlu0 %v1345_v37, %s1756_s0 }
  0x43   :  { %1356 = vrot.lane.b32.xlu1 %v1905_v36, %s1757_s1 }
  0x45   :  { %1361 = vrot.lane.b32.xlu2 %v1340_v32, %s1758_s11  ;;  %1351 = vrot.lane.b32.xlu0 %v1879_v16, %s1757_s1 }
  0x4b   :  { %1371 = vrot.lane.b32.xlu1 %v1879_v16, %s1758_s11 }
  0x4d   :  { %1376 = vrot.lane.b32.xlu2 %v1905_v36, %s1758_s11  ;;  %1366 = vrot.lane.b32.xlu0 %v1345_v37, %s1758_s11 }
  0x53   :  { %1386 = vrot.lane.b32.xlu1 %v1345_v37, %s1759_s12 }
  0x55   :  { %1391 = vrot.lane.b32.xlu2 %v1340_v32, %s1760_s13  ;;  %1381 = vrot.lane.b32.xlu0 %v1340_v32, %s1759_s12 }
  0x5b   :  { %1401 = vrot.lane.b32.xlu1 %v1345_v37, %s1760_s13 }
  0x5d   :  { %1406 = vrot.lane.b32.xlu2 %v1879_v16, %s1760_s13  ;;  %1396 = vrot.lane.b32.xlu0 %v1395_v21, %s1760_s13 }
  0x63   :  { %1416 = vrot.lane.b32.xlu1 %v1395_v21, %s1761_s14 }
  0x65   :  { %1421 = vrot.lane.b32.xlu2 %v1345_v37, %s1761_s14  ;;  %1411 = vrot.lane.b32.xlu0 %v1340_v32, %s1761_s14 }
  0x6b   :  { %1431 = vrot.lane.b32.xlu1 %v1340_v32, %s1762_s15 }
  0x6d   :  { %1436 = vrot.lane.b32.xlu2 %v1395_v21, %s1762_s15  ;;  %1426 = vrot.lane.b32.xlu0 %v1879_v16, %s1761_s14 }
  0x73   :  { %1446 = vrot.lane.b32.xlu1 %v1879_v16, %s1762_s15 }
  0x75   :  { %1451 = vrot.lane.b32.xlu2 %v1340_v32, %s1763_s16  ;;  %1441 = vrot.lane.b32.xlu0 %v1345_v37, %s1762_s15 }
  0x7b   :  { %1461 = vrot.lane.b32.xlu1 %v1345_v37, %s1763_s16 }
  0x7d   :  { %1466 = vrot.lane.b32.xlu2 %v1879_v16, %s1763_s16  ;;  %1456 = vrot.lane.b32.xlu0 %v1395_v21, %s1763_s16 }
  0x83   :  { %1476 = vrot.lane.b32.xlu1 %v1879_v16, %s1759_s12  ;;  %v307_v16 = vlaneseq }
  0x85   :  { %1481 = vrot.lane.b32.xlu2 %v1395_v21, %s1757_s1  ;;  %1471 = vrot.lane.b32.xlu0 %v1395_v21, %s1756_s0  ;;  %v1997_v28 = vand.u32 127, %v307_v16 }
  0x87   :  { %vm531_vm1 = vcmp.lt.s32.totalorder %v1997_v28, 110  ;;  %vm494_vm2 = vcmp.lt.s32.totalorder %v1997_v28, 111  ;;  %vm457_vm3 = vcmp.lt.s32.totalorder %v1997_v28, 127  ;;  %vm568_vm4 = vcmp.lt.s32.totalorder %v1997_v28, 109 }
  0x88   :  { %vm420_vm5 = vcmp.lt.s32.totalorder %v1997_v28, 1  ;;  %vm383_vm6 = vcmp.lt.s32.totalorder %v1997_v28, 17  ;;  %vm346_vm7 = vcmp.lt.s32.totalorder %v1997_v28, 18  ;;  %vm309_vm9 = vcmp.lt.s32.totalorder %v1997_v28, 19 }
  0x8b   :  { %1491 = vrot.lane.b32.xlu1 %v1395_v21, %s1758_s11 }
  0x8d   :  { %1496 = vrot.lane.b32.xlu2 %v1495_v20, %s1757_s1  ;;  %1486 = vrot.lane.b32.xlu0 %v1495_v20, %s1756_s0 }
  0x8f   :  { %v1973_v4 = vpop.permute.xlu2 %1341 }
  0x90   :  { %v2891_v30 = vunpack.i.h.bf16 %v1973_v4  ;;  %v1343_v31 = vunpack.i.l.bf16 %v1973_v4 }
  0x93   :  { %1506 = vrot.lane.b32.xlu1 %v1905_v36, %s1759_s12 }
  0x95   :  { %1511 = vrot.lane.b32.xlu2 %v1495_v20, %s1759_s12  ;;  %1501 = vrot.lane.b32.xlu0 %v1495_v20, %s1758_s11 }
  0x97   :  { %v1347_v22 = vpop.permute.xlu2 %1346 }
  0x98   :  { %v1349_v32 = vunpack.i.h.bf16 %v1347_v22  ;;  %v1348_v37 = vunpack.i.l.bf16 %v1347_v22 }
  0x9a   :  { %v503_v53 = vsel %vm494_vm2, %v1343_v31, %v1348_v37  ;;  %v504_v54 = vsel %vm494_vm2, %v2891_v30, %v1349_v32 }
  0x9b   :  { %1521 = vrot.lane.b32.xlu1 %v1495_v20, %s1760_s13  ;;  %v617_v58 = vpack.c.bf16 %v504_v54, %v503_v53 }
  0x9d   :  { %1526 = vrot.lane.b32.xlu2 %v1495_v20, %s1761_s14  ;;  %1516 = vrot.lane.b32.xlu0 %v1395_v21, %s1759_s12 }
  0x9f   :  { %v1982_v23 = vpop.permute.xlu2 %1361 }
  0xa0   :  { %v1364_v14 = vunpack.i.h.bf16 %v1982_v23  ;;  %v1363_v15 = vunpack.i.l.bf16 %v1982_v23 }
  0xa3   :  { %1536 = vrot.lane.b32.xlu1 %v1495_v20, %s1762_s15 }
  0xa5   :  { %1541 = vrot.lane.b32.xlu2 %v1905_v36, %s1761_s14  ;;  %1531 = vrot.lane.b32.xlu0 %v1905_v36, %s1760_s13  ;;  %v1989_v25 = vpop.permute.xlu1 %1331 }
  0xa6   :  { %v1334_v38 = vunpack.i.h.bf16 %v1989_v25  ;;  %v1333_v39 = vunpack.i.l.bf16 %v1989_v25 }
  0xa7   :  { %v1991_v26 = vpop.permute.xlu2 %1376  ;;  %v1993_v27 = vpop.permute.xlu0 %1321 }
  0xa8   :  { %v1323_v42 = vunpack.i.l.bf16 %v1993_v27 }
  0xab   :  { %1551 = vrot.lane.b32.xlu1 %v1905_v36, %s1762_s15 }
  0xad   :  { %1556 = vrot.lane.b32.xlu2 %v1905_v36, %s1763_s16  ;;  %1546 = vrot.lane.b32.xlu0 %v1495_v20, %s1763_s16  ;;  %v2002_v3 = vpop.permute.xlu1 %1336  ;;  %v1324_v36 = vunpack.i.h.bf16 %v1993_v27 }
  0xaf   :  { %v2009_v40 = vpop.permute.xlu2 %1391  ;;  %v1327_v41 = vpop.permute.xlu0 %1326 }
  0xb0   :  { %v1329_v43 = vunpack.i.h.bf16 %v1327_v41  ;;  %v1328_v44 = vunpack.i.l.bf16 %v1327_v41 }
  0xb2   :  { %v540_v47 = vsel %vm531_vm1, %v1323_v42, %v1328_v44  ;;  %v541_v48 = vsel %vm531_vm1, %v1324_v36, %v1329_v43  ;;  %v538_v49 = vsel %vm531_vm1, %v1328_v44, %v1333_v39  ;;  %v539_v50 = vsel %vm531_vm1, %v1329_v43, %v1334_v38 }
  0xb3   :  { %v623_v51 = vpack.c.bf16 %v541_v48, %v540_v47  ;;  %v624_v52 = vpack.c.bf16 %v539_v50, %v538_v49  ;;  %v1339_v44 = vunpack.i.h.bf16 %v2002_v3  ;;  %v1338_v47 = vunpack.i.l.bf16 %v2002_v3 }
  0xb4   :  { %v605_v49 = vpack.c.bf16 %v1883_v29, %v1868_v19  ;;  %v606_v50 = vpack.c.bf16 %v1901_v35, %v1898_v5 }
  0xb5   :  { %649 = vmatpush.bf16.msra.mxu0 %v623_v51  ;;  %675 = vmatpush.bf16.msra.mxu2 %v624_v52  ;;  %v2036_v55 = vpop.permute.xlu1 %1356  ;;  %v536_v29 = vsel %vm531_vm1, %v1333_v39, %v1338_v47  ;;  %v537_v5 = vsel %vm531_vm1, %v1334_v38, %v1339_v44  ;;  %v2893_v38 = vunpack.i.h.bf16 %v1991_v26 }
  0xb6   :  { %v1358_v19 = vunpack.i.l.bf16 %v2036_v55 }
  0xb7   :  { %v2038_v21 = vpop.permute.xlu2 %1406  ;;  %v1352_v57 = vpop.permute.xlu0 %1351 }
  0xb8   :  { %v1354_v59 = vunpack.i.h.bf16 %v1352_v57  ;;  %v1353_v60 = vunpack.i.l.bf16 %v1352_v57 }
  0xb9   :  { %650 = vmatpush.bf16.msra.mxu0 %v617_v58 }
  0xba   :  { %v501_v61 = vsel %vm494_vm2, %v1348_v37, %v1353_v60  ;;  %v502_v62 = vsel %vm494_vm2, %v1349_v32, %v1354_v59 }
  0xbb   :  { %v618_v63 = vpack.c.bf16 %v502_v62, %v501_v61  ;;  %v1359_v61 = vunpack.i.h.bf16 %v2036_v55  ;;  %v625_v62 = vpack.c.bf16 %v537_v5, %v536_v29  ;;  %v635_v55 = vld [vmem:[%s2875_s4] sm:$0xf] }
  0xbd   :  { %676 = vmatpush.bf16.msra.mxu2 %v618_v63  ;;  %v1372_v2 = vpop.permute.xlu1 %1371  ;;  %v1378_v63 = vunpack.i.l.bf16 %v1991_v26 }
  0xbe   :  { %v1374_v9 = vunpack.i.h.bf16 %v1372_v2  ;;  %v1373_v11 = vunpack.i.l.bf16 %v1372_v2 }
  0xbf   :  { %v2044_v12 = vpop.permute.xlu2 %1421  ;;  %v1367_v13 = vpop.permute.xlu0 %1366 }
  0xc0   :  { %v1369_v17 = vunpack.i.h.bf16 %v1367_v13  ;;  %v1368_v20 = vunpack.i.l.bf16 %v1367_v13  ;;  %v499_v13 = vsel %vm494_vm2, %v1353_v60, %v1358_v19  ;;  %v463_v29 = vsel %vm457_vm3, %v1374_v9, %v2893_v38 }
  0xc2   :  { %v466_v22 = vsel %vm457_vm3, %v1363_v15, %v1368_v20  ;;  %v467_v16 = vsel %vm457_vm3, %v1364_v14, %v1369_v17  ;;  %v464_v32 = vsel %vm457_vm3, %v1368_v20, %v1373_v11  ;;  %v465_v37 = vsel %vm457_vm3, %v1369_v17, %v1374_v9 }
  0xc3   :  { %v611_v41 = vpack.c.bf16 %v467_v16, %v466_v22  ;;  %v612_v43 = vpack.c.bf16 %v465_v37, %v464_v32  ;;  %v500_v17 = vsel %vm494_vm2, %v1354_v59, %v1359_v61  ;;  %v1394_v16 = vunpack.i.h.bf16 %v2009_v40 }
  0xc4   :  { %v1393_v32 = vunpack.i.l.bf16 %v2009_v40  ;;  %v462_v40 = vsel %vm457_vm3, %v1373_v11, %v1378_v63 }
  0xc5   :  { %651 = vmatpush.bf16.msra.mxu0 %v611_v41  ;;  %677 = vmatpush.bf16.msra.mxu2 %v612_v43  ;;  %v2063_v48 = vpop.permute.xlu1 %1386  ;;  %v613_v11 = vpack.c.bf16 %v463_v29, %v462_v40 }
  0xc6   :  { %v1389_v51 = vunpack.i.h.bf16 %v2063_v48  ;;  %v1388_v52 = vunpack.i.l.bf16 %v2063_v48 }
  0xc7   :  { %v2071_v53 = vpop.permute.xlu2 %1436  ;;  %v2073_v54 = vpop.permute.xlu0 %1381 }
  0xc8   :  { %v2884_v57 = vunpack.i.h.bf16 %v2073_v54  ;;  %v2888_v58 = vunpack.i.l.bf16 %v2073_v54 }
  0xc9   :  { %652 = vmatpush.bf16.msra.mxu0 %v605_v49  ;;  %678 = vmatpush.bf16.msra.mxu2 %v606_v50  ;;  %v619_v49 = vpack.c.bf16 %v500_v17, %v499_v13  ;;  %v607_v13 = vpack.c.bf16 %v1874_v24, %v1865_v10  ;;  %v282_v17 = vld [vmem:[%s2873_s2] sm:$0xf] }
  0xca   :  { %v577_v35 = vsel %vm568_vm4, %v2888_v58, %v1388_v52  ;;  %v578_v39 = vsel %vm568_vm4, %v2884_v57, %v1389_v51  ;;  %642 = vst [vmem:[#allocation1] ss:$4 sm:$0xff] %v282_v17 }
  0xcb   :  { %v629_v25 = vpack.c.bf16 %v578_v39, %v577_v35  ;;  %1192 = vst [vmem:[#allocation1 + $0x10] ss:$2 sm:$0xff] %v1829_v7 }
  0xcd   :  { %669 = vmatpush.bf16.msra.mxu1 %v629_v25  ;;  %v1402_v2 = vpop.permute.xlu1 %1401 }
  0xce   :  { %v1404_v20 = vunpack.i.h.bf16 %v1402_v2  ;;  %v1403_v22 = vunpack.i.l.bf16 %v1402_v2  ;;  %v2880_v2 = vunpack.i.l.bf16 %v2038_v21 }
  0xcf   :  { %v2115_v37 = vpop.permute.xlu2 %1451  ;;  %v2117_v41 = vpop.permute.xlu0 %1396 }
  0xd0   :  { %v2889_v60 = vunpack.i.h.bf16 %v2117_v41  ;;  %v2890_v43 = vunpack.i.l.bf16 %v2117_v41  ;;  %v429_v59 = vsel %vm420_vm5, %v1393_v32, %v1403_v22  ;;  %v430_v50 = vsel %vm420_vm5, %v1394_v16, %v1404_v20 }
  0xd1   :  { %701 = vmatpush.bf16.msrb.mxu1 %v625_v62  ;;  %v600_v39 = vpack.c.bf16 %v430_v50, %v429_v59  ;;  %v2879_v62 = vunpack.i.h.bf16 %v2038_v21 }
  0xd2   :  { %v431_v5 = vsel %vm420_vm5, %v2890_v43, %v1393_v32  ;;  %v432_v35 = vsel %vm420_vm5, %v2889_v60, %v1394_v16  ;;  %v1424_v16 = vunpack.i.h.bf16 %v2044_v12  ;;  %v1423_v32 = vunpack.i.l.bf16 %v2044_v12 }
  0xd3   :  { %v599_v25 = vpack.c.bf16 %v432_v35, %v431_v5  ;;  %679 = vmatpush.bf16.msra.mxu2 %v600_v39  ;;  %v427_v12 = vsel %vm420_vm5, %v1403_v22, %v2880_v2  ;;  %v428_v29 = vsel %vm420_vm5, %v1404_v20, %v2879_v62 }
  0xd4   :  { %v601_v20 = vpack.c.bf16 %v428_v29, %v427_v12 }
  0xd5   :  { %702 = vmatpush.bf16.msrb.mxu1 %v619_v49  ;;  %653 = vmatpush.bf16.msra.mxu0 %v599_v25  ;;  %v2143_v9 = vpop.permute.xlu1 %1416 }
  0xd6   :  { %v1419_v49 = vunpack.i.h.bf16 %v2143_v9  ;;  %v1418_v59 = vunpack.i.l.bf16 %v2143_v9 }
  0xd7   :  { %v2154_v50 = vpop.permute.xlu2 %1466  ;;  %v1412_v40 = vpop.permute.xlu0 %1411 }
  0xd8   :  { %v1414_v10 = vunpack.i.h.bf16 %v1412_v40  ;;  %v1413_v24 = vunpack.i.l.bf16 %v1412_v40  ;;  %v2180_v40 = vld.sshfl [vmem:[#allocation1] sm:$0xff pattern:$0x73625140] }
  0xd9   :  { %703 = vmatpush.bf16.msrb.mxu1 %v613_v11  ;;  %v2881_v11 = vunpack.i.h.bf16 %v2071_v53 }
  0xda   :  { %v394_v5 = vsel %vm383_vm6, %v1418_v59, %v1413_v24  ;;  %v395_v7 = vsel %vm383_vm6, %v1419_v49, %v1414_v10  ;;  %v392_v35 = vsel %vm383_vm6, %v1413_v24, %v1423_v32  ;;  %v393_v22 = vsel %vm383_vm6, %v1414_v10, %v1424_v16  ;;  %v2183_v24 = vld.sshfl [vmem:[#allocation1 + $0x8] sm:$0xff pattern:$0x73625140] }
  0xdb   :  { %v593_v39 = vpack.c.bf16 %v395_v7, %v394_v5  ;;  %v594_v25 = vpack.c.bf16 %v393_v22, %v392_v35  ;;  %1296 = vmatmul.msk.bf16.vlgmr.msra.gmra.mxu1 %vm646_vm8, %v2183_v24  ;;  %1190 = vst [vmem:[#allocation1] ss:$2 sm:$0xff] %v1831_v8 }
  0xdd   :  { %704 = vmatpush.bf16.msrb.mxu1 %v607_v13  ;;  %v2882_v13 = vunpack.i.l.bf16 %v2071_v53  ;;  %654 = vmatpush.bf16.msra.mxu0 %v593_v39  ;;  %v1432_v17 = vpop.permute.xlu1 %1431 }
  0xde   :  { %680 = vmatpush.bf16.msra.mxu2 %v594_v25  ;;  %v1434_v62 = vunpack.i.h.bf16 %v1432_v17  ;;  %v1433_v2 = vunpack.i.l.bf16 %v1432_v17 }
  0xdf   :  { %v2185_v10 = vpop.permute.xlu2 %1481  ;;  %v2187_v12 = vpop.permute.xlu0 %1426 }
  0xe0   :  { %v2885_v29 = vunpack.i.h.bf16 %v2187_v12  ;;  %v2883_v5 = vunpack.i.l.bf16 %v2187_v12  ;;  %v357_v7 = vsel %vm346_vm7, %v2882_v13, %v1433_v2  ;;  %v358_v35 = vsel %vm346_vm7, %v2881_v11, %v1434_v62 }
  0xe1   :  { %705 = vmatpush.bf16.msrb.mxu1 %v601_v20  ;;  %v587_v22 = vpack.c.bf16 %v358_v35, %v357_v7 }
  0xe2   :  { %v390_v8 = vsel %vm383_vm6, %v1423_v32, %v2883_v5  ;;  %v391_v39 = vsel %vm383_vm6, %v1424_v16, %v2885_v29 }
  0xe3   :  { %v595_v25 = vpack.c.bf16 %v391_v39, %v390_v8  ;;  %655 = vmatpush.bf16.msra.mxu0 %v587_v22 }
  0xe5   :  { %706 = vmatpush.bf16.msrb.mxu1 %v595_v25  ;;  %v2210_v20 = vpop.permute.xlu1 %1446 }
  0xe6   :  { %v2886_v17 = vunpack.i.h.bf16 %v2210_v20  ;;  %v2887_v11 = vunpack.i.l.bf16 %v2210_v20 }
  0xe7   :  { %v2214_v7 = vpop.permute.xlu2 %1496  ;;  %v1442_v35 = vpop.permute.xlu0 %1441 }
  0xe8   :  { %v1499_v13 = vunpack.i.h.bf16 %v2214_v7  ;;  %v1498_v32 = vunpack.i.l.bf16 %v2214_v7  ;;  %v1444_v5 = vunpack.i.h.bf16 %v1442_v35  ;;  %v1443_v57 = vunpack.i.l.bf16 %v1442_v35 }
  0xea   :  { %v355_v16 = vsel %vm346_vm7, %v1433_v2, %v1443_v57  ;;  %v356_v22 = vsel %vm346_vm7, %v1434_v62, %v1444_v5  ;;  %v353_v8 = vsel %vm346_vm7, %v1443_v57, %v2887_v11  ;;  %v354_v39 = vsel %vm346_vm7, %v1444_v5, %v2886_v17 }
  0xeb   :  { %v588_v25 = vpack.c.bf16 %v356_v22, %v355_v16  ;;  %v589_v29 = vpack.c.bf16 %v354_v39, %v353_v8  ;;  %v2236_v2 = vsel %vm494_vm2, %v1358_v19, %v1498_v32  ;;  %v2244_v57 = vsel %vm494_vm2, %v1359_v61, %v1499_v13 }
  0xec   :  { %v2894_v62 = vunpack.i.h.bf16 %v2154_v50  ;;  %v2892_v5 = vunpack.i.l.bf16 %v2154_v50  ;;  %v1764_v8 = vmov 0   ;;  %v1454_v61 = vunpack.i.h.bf16 %v2115_v37 }
  0xed   :  { %681 = vmatpush.bf16.msra.mxu2 %v588_v25  ;;  %707 = vmatpush.bf16.msrb.mxu1 %v589_v29  ;;  %v1462_v35 = vpop.permute.xlu1 %1461  ;;  %v1453_v39 = vunpack.i.l.bf16 %v2115_v37 }
  0xee   :  { %v1464_v19 = vunpack.i.h.bf16 %v1462_v35  ;;  %v1463_v22 = vunpack.i.l.bf16 %v1462_v35  ;;  %1560 = vset.pattern.permute.xlu0 %v1764_v8 }
  0xef   :  { %v2256_v25 = vpop.permute.xlu2 %1511  ;;  %v2258_v29 = vpop.permute.xlu0 %1456  ;;  %638 = vperm.xlu0 %1560, %v635_v55  }
  0xf0   :  { %v1459_v17 = vunpack.i.h.bf16 %v2258_v29  ;;  %v1458_v35 = vunpack.i.l.bf16 %v2258_v29  ;;  %v318_v8 = vsel %vm309_vm9, %v1453_v39, %v1463_v22  ;;  %v319_v11 = vsel %vm309_vm9, %v1454_v61, %v1464_v19 }
  0xf1   :  { %v316_v37 = vsel %vm309_vm9, %v1463_v22, %v2892_v5  ;;  %v317_v55 = vsel %vm309_vm9, %v1464_v19, %v2894_v62  ;;  %v582_v60 = vpack.c.bf16 %v319_v11, %v318_v8 }
  0xf2   :  { %v320_v58 = vsel %vm309_vm9, %v1458_v35, %v1453_v39  ;;  %v321_v16 = vsel %vm309_vm9, %v1459_v17, %v1454_v61  ;;  %v583_v43 = vpack.c.bf16 %v317_v55, %v316_v37 }
  0xf3   :  { %v581_v30 = vpack.c.bf16 %v321_v16, %v320_v58  ;;  %682 = vmatpush.bf16.msra.mxu2 %v582_v60 }
  0xf4   :  { %708 = vmatpush.bf16.msrb.mxu1 %v583_v43 }
  0xf5   :  { %656 = vmatpush.bf16.msra.mxu0 %v581_v30  ;;  %v1477_v22 = vpop.permute.xlu1 %1476 }
  0xf6   :  { %v1479_v5 = vunpack.i.h.bf16 %v1477_v22  ;;  %v1478_v38 = vunpack.i.l.bf16 %v1477_v22  ;;  %683 = vmatmul.bf16.vlgmr.msra.gmra.mxu2 %v2180_v40  ;;  %v1484_v22 = vunpack.i.h.bf16 %v2185_v10 }
  0xf7   :  { %v2282_v19 = vpop.permute.xlu2 %1526  ;;  %v1472_v62 = vpop.permute.xlu0 %1471  ;;  %709 = vmatmul.bf16.vlgmr.msrb.gmra.mxu1 %v2180_v40 }
  0xf8   :  { %v1529_v39 = vunpack.i.h.bf16 %v2282_v19  ;;  %v1528_v61 = vunpack.i.l.bf16 %v2282_v19  ;;  %657 = vmatmul.bf16.vlgmr.msra.gmra.mxu0 %v2180_v40  ;;  %v575_v30 = vsel %vm568_vm4, %v1388_v52, %v1478_v38  ;;  %v576_v58 = vsel %vm568_vm4, %v1389_v51, %v1479_v5 }
  0xf9   :  { %v630_v60 = vpack.c.bf16 %v576_v58, %v575_v30  ;;  %v1473_v37 = vunpack.i.l.bf16 %v1472_v62  ;;  %v496_v3 = vsel %vm494_vm2, %v1499_v13, %v1484_v22 }
  0xfa   :  { %v2303_v43 = vsel %vm383_vm6, %v1528_v61, %v1418_v59  ;;  %v2311_v52 = vsel %vm383_vm6, %v1529_v39, %v1419_v49  ;;  %v1474_v59 = vunpack.i.h.bf16 %v1472_v62  ;;  %v1483_v49 = vunpack.i.l.bf16 %v2185_v10 }
  0xfb   :  { %695 = vmatpush.bf16.msra.mxu3 %v630_v60  ;;  %v598_v48 = vpack.c.bf16 %v2311_v52, %v2303_v43 }
  0xfc   :  { %v543_v13 = vsel %vm531_vm1, %v1474_v59, %v1324_v36 }
  0xfd   :  { %v1492_v51 = vpop.permute.xlu1 %1491 }
  0xfe   :  { %v1494_v11 = vunpack.i.h.bf16 %v1492_v51  ;;  %v1493_v16 = vunpack.i.l.bf16 %v1492_v51  ;;  %1297 = vmatmul.msk.bf16.vlgmr.msra.gmra.mxu3 %vm646_vm8, %v2183_v24 }
  0xff   :  { %v1487_v8 = vpop.permute.xlu0 %1486 }
 0x100   :  { %v1489_v9 = vunpack.i.h.bf16 %v1487_v8  ;;  %v1488_v55 = vunpack.i.l.bf16 %v1487_v8  ;;  %v2323_v30 = vsel %vm457_vm3, %v1493_v16, %v1363_v15  ;;  %v2329_v58 = vsel %vm457_vm3, %v1494_v11, %v1364_v14 }
 0x101   :  { %v616_v14 = vpack.c.bf16 %v2329_v58, %v2323_v30  ;;  %v1513_v8 = vunpack.i.l.bf16 %v2256_v25  ;;  %v2903_v30 = vunpack.i.h.bf16 %v2071_v53 }
 0x102   :  { %v535_v62 = vsel %vm531_vm1, %v1339_v44, %v1489_v9  ;;  %v534_v10 = vsel %vm531_vm1, %v1338_v47, %v1488_v55  ;;  %v532_v15 = vsel %vm531_vm1, %v1488_v55, %v1473_v37  ;;  %v533_v23 = vsel %vm531_vm1, %v1489_v9, %v1474_v59 }
 0x103   :  { %v626_v60 = vpack.c.bf16 %v535_v62, %v534_v10  ;;  %v627_v51 = vpack.c.bf16 %v533_v23, %v532_v15  ;;  %v495_v44 = vsel %vm494_vm2, %v1498_v32, %v1483_v49  ;;  %v1514_v47 = vunpack.i.h.bf16 %v2256_v25 }
 0x104   :  { %v621_v15 = vpack.c.bf16 %v496_v3, %v495_v44  ;;  %v542_v32 = vsel %vm531_vm1, %v1473_v37, %v1323_v42 }
 0x105   :  { %753 = vmatpush.bf16.msrb.mxu2 %v627_v51  ;;  %v1507_v9 = vpop.permute.xlu1 %1506 }
 0x106   :  { %v1509_v55 = vunpack.i.h.bf16 %v1507_v9  ;;  %v1508_v62 = vunpack.i.l.bf16 %v1507_v9  ;;  %v2895_v9 = vunpack.i.h.bf16 %v1991_v26 }
 0x107   :  { %v1502_v10 = vpop.permute.xlu0 %1501 }
 0x108   :  { %v1504_v7 = vunpack.i.h.bf16 %v1502_v10  ;;  %v1503_v23 = vunpack.i.l.bf16 %v1502_v10  ;;  %v573_v25 = vsel %vm568_vm4, %v1478_v38, %v1508_v62  ;;  %v574_v51 = vsel %vm568_vm4, %v1479_v5, %v1509_v55 }
 0x109   :  { %754 = vmatpush.bf16.msrb.mxu2 %v621_v15  ;;  %v571_v44 = vsel %vm568_vm4, %v1508_v62, %v1513_v8  ;;  %v572_v42 = vsel %vm568_vm4, %v1509_v55, %v1514_v47  ;;  %v631_v37 = vpack.c.bf16 %v574_v51, %v573_v25  ;;  %v505_v38 = vsel %vm494_vm2, %v1483_v49, %v1343_v31  ;;  %v1542_v25 = vpop.permute.xlu2 %1541 }
 0x10a   :  { %v632_v27 = vpack.c.bf16 %v572_v42, %v571_v44  ;;  %v458_v36 = vsel %vm457_vm3, %v1503_v23, %v1493_v16  ;;  %v459_v59 = vsel %vm457_vm3, %v1504_v7, %v1494_v11  ;;  %v460_v5 = vsel %vm457_vm3, %v1378_v63, %v1503_v23 }
 0x10b   :  { %v615_v3 = vpack.c.bf16 %v459_v59, %v458_v36  ;;  %v461_v55 = vsel %vm457_vm3, %v2895_v9, %v1504_v7  ;;  %v628_v16 = vpack.c.bf16 %v543_v13, %v542_v32  ;;  %721 = vmatpush.bf16.msrb.mxu3 %v631_v37  ;;  %v2896_v11 = vunpack.i.h.bf16 %v1973_v4 }
 0x10c   :  { %747 = vmatpush.bf16.msrb.mxu0 %v632_v27  ;;  %v614_v10 = vpack.c.bf16 %v461_v55, %v460_v5  ;;  %v609_v63 = vpack.c.bf16 %v1966_v45, %v1963_v18  ;;  %v2897_v13 = vunpack.i.l.bf16 %v2117_v41  ;;  %v2898_v18 = vunpack.i.h.bf16 %v2117_v41 }
 0x10d   :  { %v506_v62 = vsel %vm494_vm2, %v1484_v22, %v2896_v11  ;;  %755 = vmatpush.bf16.msrb.mxu2 %v615_v3  ;;  %v1522_v31 = vpop.permute.xlu1 %1521  ;;  %v2899_v7 = vpack.c.bf16 %v2244_v57, %v2236_v2  ;;  %v2900_v42 = vunpack.i.l.bf16 %v2073_v54  ;;  %v2901_v37 = vunpack.i.h.bf16 %v2073_v54 }
 0x10e   :  { %v1524_v26 = vunpack.i.h.bf16 %v1522_v31  ;;  %v1523_v49 = vunpack.i.l.bf16 %v1522_v31  ;;  %1298 = vmatmul.msk.bf16.vlgmr.msrb.gmra.mxu3 %vm646_vm8, %v2183_v24  ;;  %v622_v32 = vpack.c.bf16 %v506_v62, %v505_v38  ;;  %v610_v54 = vpack.c.bf16 %v1932_v46, %v1929_v56 }
 0x10f   :  { %727 = vmatpush.bf16.msra.mxu3 %v626_v60  ;;  %v1517_v15 = vpop.permute.xlu0 %1516  ;;  %1299 = vmatmul.msk.bf16.vlgmr.msrb.gmra.mxu0 %vm646_vm8, %v2183_v24  ;;  %v1544_v3 = vunpack.i.h.bf16 %v1542_v25  ;;  %v1543_v38 = vunpack.i.l.bf16 %v1542_v25  ;;  %v2905_v62 = vunpack.i.h.bf16 %v2038_v21 }
 0x110   :  { %779 = vmatpush.bf16.msra.mxu0 %v628_v16  ;;  %v1519_v4 = vunpack.i.h.bf16 %v1517_v15  ;;  %v1518_v22 = vunpack.i.l.bf16 %v1517_v15  ;;  %v421_v60 = vsel %vm420_vm5, %v1523_v49, %v2897_v13  ;;  %v422_v45 = vsel %vm420_vm5, %v1524_v26, %v2898_v18 }
 0x111   :  { %756 = vmatpush.bf16.msrb.mxu2 %v609_v63  ;;  %v604_v23 = vpack.c.bf16 %v422_v45, %v421_v60  ;;  %v2904_v16 = vunpack.i.l.bf16 %v2038_v21  ;;  %v1557_v63 = vpop.permute.xlu2 %1556  ;;  %v2906_v15 = vunpack.i.l.bf16 %v2187_v12 }
 0x112   :  { %v570_v51 = vsel %vm568_vm4, %v1514_v47, %v1519_v4  ;;  %v569_v44 = vsel %vm568_vm4, %v1513_v8, %v1518_v22  ;;  %v579_v41 = vsel %vm568_vm4, %v1518_v22, %v2900_v42  ;;  %v580_v2 = vsel %vm568_vm4, %v1519_v4, %v2901_v37 }
 0x113   :  { %728 = vmatpush.bf16.msra.mxu3 %v2899_v7  ;;  %v633_v57 = vpack.c.bf16 %v570_v51, %v569_v44  ;;  %v634_v27 = vpack.c.bf16 %v580_v2, %v579_v41  ;;  %v608_v47 = vpack.c.bf16 %v1893_v34, %v1890_v33  ;;  %v2902_v33 = vunpack.i.l.bf16 %v2071_v53 }
 0x114   :  { %780 = vmatpush.bf16.msra.mxu0 %v622_v32  ;;  %v388_v21 = vsel %vm383_vm6, %v2906_v15, %v1543_v38  ;;  %v2907_v32 = vunpack.i.h.bf16 %v2187_v12  ;;  %v1559_v19 = vunpack.i.h.bf16 %v1557_v63  ;;  %v1558_v60 = vunpack.i.l.bf16 %v1557_v63 }
 0x115   :  { %773 = vmatpush.bf16.msra.mxu1 %v633_v57  ;;  %v1537_v36 = vpop.permute.xlu1 %1536  ;;  %v2909_v41 = vunpack.i.h.bf16 %v2210_v20 }
 0x116   :  { %v1539_v8 = vunpack.i.h.bf16 %v1537_v36  ;;  %v1538_v59 = vunpack.i.l.bf16 %v1537_v36  ;;  %v389_v4 = vsel %vm383_vm6, %v2907_v32, %v1544_v3  ;;  %v2910_v36 = vunpack.i.l.bf16 %v2154_v50 }
 0x117   :  { %729 = vmatpush.bf16.msra.mxu3 %v614_v10  ;;  %v1532_v5 = vpop.permute.xlu0 %1531  ;;  %v596_v45 = vpack.c.bf16 %v389_v4, %v388_v21 }
 0x118   :  { %781 = vmatpush.bf16.msra.mxu0 %v616_v14  ;;  %v1534_v9 = vunpack.i.h.bf16 %v1532_v5  ;;  %v1533_v55 = vunpack.i.l.bf16 %v1532_v5  ;;  %1300 = vmatmul.msk.bf16.vlgmr.msra.gmra.mxu1 %vm646_vm8, %v2183_v24  ;;  %v347_v34 = vsel %vm346_vm7, %v1538_v59, %v2902_v33  ;;  %v348_v58 = vsel %vm346_vm7, %v1539_v8, %v2903_v30 }
 0x119   :  { %799 = vmatpush.bf16.msrb.mxu1 %v634_v27  ;;  %v592_v56 = vpack.c.bf16 %v348_v58, %v347_v34 }
 0x11a   :  { %v423_v46 = vsel %vm420_vm5, %v1533_v55, %v1523_v49  ;;  %v424_v14 = vsel %vm420_vm5, %v1534_v9, %v1524_v26  ;;  %v425_v11 = vsel %vm420_vm5, %v2904_v16, %v1533_v55  ;;  %v426_v53 = vsel %vm420_vm5, %v2905_v62, %v1534_v9 }
 0x11b   :  { %730 = vmatpush.bf16.msra.mxu3 %v608_v47  ;;  %v603_v10 = vpack.c.bf16 %v424_v14, %v423_v46  ;;  %v602_v31 = vpack.c.bf16 %v426_v53, %v425_v11  ;;  %v386_v49 = vsel %vm383_vm6, %v1543_v38, %v1528_v61  ;;  %v387_v26 = vsel %vm383_vm6, %v1544_v3, %v1529_v39 }
 0x11c   :  { %782 = vmatpush.bf16.msra.mxu0 %v610_v54  ;;  %v597_v39 = vpack.c.bf16 %v387_v26, %v386_v49  ;;  %v314_v47 = vsel %vm309_vm9, %v2910_v36, %v1558_v60 }
 0x11d   :  { %757 = vmatpush.bf16.msrb.mxu2 %v603_v10  ;;  %v1552_v22 = vpop.permute.xlu1 %1551 }
 0x11e   :  { %v1554_v61 = vunpack.i.h.bf16 %v1552_v22  ;;  %v1553_v13 = vunpack.i.l.bf16 %v1552_v22 }
 0x11f   :  { %731 = vmatpush.bf16.msra.mxu3 %v602_v31  ;;  %v1547_v18 = vpop.permute.xlu0 %1546 }
 0x120   :  { %783 = vmatpush.bf16.msra.mxu0 %v604_v23  ;;  %v1549_v7 = vunpack.i.h.bf16 %v1547_v18  ;;  %v1548_v25 = vunpack.i.l.bf16 %v1547_v18  ;;  %v349_v51 = vsel %vm346_vm7, %v1553_v13, %v1538_v59  ;;  %v350_v12 = vsel %vm346_vm7, %v1554_v61, %v1539_v8 }
 0x121   :  { %758 = vmatpush.bf16.msrb.mxu2 %v597_v39  ;;  %v591_v44 = vpack.c.bf16 %v350_v12, %v349_v51  ;;  %v2908_v23 = vunpack.i.l.bf16 %v2210_v20  ;;  %v352_v37 = vsel %vm346_vm7, %v2909_v41, %v1554_v61  ;;  %v2911_v20 = vunpack.i.h.bf16 %v2154_v50 }
 0x122   :  { %v312_v57 = vsel %vm309_vm9, %v1558_v60, %v1548_v25  ;;  %v313_v27 = vsel %vm309_vm9, %v1559_v19, %v1549_v7  ;;  %v310_v52 = vsel %vm309_vm9, %v1548_v25, %v1458_v35 }
 0x123   :  { %732 = vmatpush.bf16.msra.mxu3 %v596_v45  ;;  %v351_v42 = vsel %vm346_vm7, %v2908_v23, %v1553_v13  ;;  %v315_v8 = vsel %vm309_vm9, %v2911_v20, %v1559_v19  ;;  %v585_v43 = vpack.c.bf16 %v313_v27, %v312_v57 }
 0x124   :  { %784 = vmatpush.bf16.msra.mxu0 %v598_v48  ;;  %v590_v2 = vpack.c.bf16 %v352_v37, %v351_v42  ;;  %v311_v48 = vsel %vm309_vm9, %v1549_v7, %v1459_v17  ;;  %v584_v59 = vpack.c.bf16 %v315_v8, %v314_v47 }
 0x125   :  { %759 = vmatpush.bf16.msrb.mxu2 %v591_v44  ;;  %v586_v54 = vpack.c.bf16 %v311_v48, %v310_v52 }
 0x127   :  { %733 = vmatpush.bf16.msra.mxu3 %v590_v2 }
 0x128   :  { %785 = vmatpush.bf16.msra.mxu0 %v592_v56  ;;  %1301 = vmatmul.msk.bf16.vlgmr.msrb.gmra.mxu1 %vm646_vm8, %v2183_v24  ;;  %v281_v24 = vld [vmem:[%s2877_s6] sm:$0x3f] }
 0x129   :  { %760 = vmatpush.bf16.msrb.mxu2 %v585_v43  ;;  %v806_v34 = vperm.slane %v281_v24, 0  ;;  %v807_v58 = vperm.slane %v281_v24, 1  ;;  %v808_v19 = vperm.slane %v281_v24, 2  ;;  %v809_v18 = vperm.slane %v281_v24, 3  ;;  %v1083_v43 = vld [vmem:[%s2876_s5] sm:$0xff] }
 0x12a   :  { %v811_v12 = vperm.slane %v281_v24, 5  ;;  %v810_v27 = vperm.slane %v281_v24, 4 }
 0x12b   :  { %734 = vmatpush.bf16.msra.mxu3 %v584_v59 }
 0x12c   :  { %786 = vmatpush.bf16.msra.mxu0 %v586_v54  ;;  %761 = vmatmul.bf16.vlgmr.msrb.gmra.mxu2 %v2180_v40 }
 0x12e   :  { %735 = vmatmul.bf16.vlgmr.msra.gmra.mxu3 %v2180_v40 }
 0x12f   :  { %787 = vmatmul.bf16.vlgmr.msra.gmra.mxu0 %v2180_v40 }
 0x158   :  { %v671_v50 = vpop.f32.mrf.mxu1 }
 0x160   :  { %v673_v29 = vpop.f32.mrf.mxu1 }
 0x161   :  { %v639_v17 = vpop.permute.xlu0 %638 }
 0x174   :  { %v710_v35 = vpop.f32.mrf.mxu1 }
 0x175   :  { %v658_v3 = vpop.f32.mrf.mxu0  ;;  %v711_v32 = vadd.f32 %v710_v35, %v639_v17 }
 0x176   :  { %v659_v5 = vadd.f32 %v658_v3, %v639_v17 }
 0x178   :  { %v672_v33 = vadd.f32 %v671_v50, %v659_v5 }
 0x179   :  { %v684_v38 = vpop.f32.mrf.mxu2 }
 0x17a   :  { %v685_v30 = vadd.f32 %v684_v38, %v639_v17  ;;  %v2508_v40 = vmul.f32 %v806_v34, %v672_v33 }
 0x17c   :  { %v712_v9 = vpop.f32.mrf.mxu1 }
 0x17d   :  { %v660_v55 = vpop.f32.mrf.mxu0 }
 0x181   :  { %v697_v56 = vpop.f32.mrf.mxu3  ;;  %v686_v46 = vpop.f32.mrf.mxu2 }
 0x182   :  { %v698_v14 = vadd.f32 %v697_v56, %v685_v30 }
 0x184   :  { %v2510_v16 = vmul.f32 %v807_v58, %v698_v14 }
 0x186   :  { %v1576_v11 = vpack.i.bf16 %v2510_v16, %v2508_v40 }
 0x188   :  { %1577 = vrot.lane.b32.xlu2 %v1576_v11, %s1757_s1  ;;  %1572 = vrot.lane.b32.xlu0 %v1576_v11, %s1756_s0 }
 0x189   :  { %1562 = vrot.lane.b32.xlu1 %v1576_v11, %s1759_s12  ;;  %v699_v62 = vpop.f32.mrf.mxu3 }
 0x18c   :  { %v749_v53 = vpop.f32.mrf.mxu0 }
 0x190   :  { %1592 = vrot.lane.b32.xlu2 %v1576_v11, %s1763_s16  ;;  %1587 = vrot.lane.b32.xlu0 %v1576_v11, %s1760_s13 }
 0x191   :  { %1567 = vrot.lane.b32.xlu1 %v1576_v11, %s1758_s11  ;;  %v723_v10 = vpop.f32.mrf.mxu3 }
 0x192   :  { %v724_v13 = vadd.f32 %v723_v10, %v711_v32 }
 0x194   :  { %v751_v31 = vpop.f32.mrf.mxu0  ;;  %v2522_v25 = vmul.f32 %v808_v19, %v724_v13 }
 0x195   :  { %v775_v63 = vpop.f32.mrf.mxu1 }
 0x199   :  { %1582 = vrot.lane.b32.xlu1 %v1576_v11, %s1762_s15  ;;  %v725_v49 = vpop.f32.mrf.mxu3 }
 0x19d   :  { %v777_v26 = vpop.f32.mrf.mxu1 }
 0x1a1   :  { %1597 = vrot.lane.b32.xlu1 %v1576_v11, %s1761_s14 }
 0x1a5   :  { %v801_v15 = vpop.f32.mrf.mxu1 }
 0x1ac   :  { %v788_v21 = vpop.f32.mrf.mxu0 }
 0x1ad   :  { %v803_v4 = vpop.f32.mrf.mxu1  ;;  %v789_v39 = vadd.f32 %v788_v21, %v639_v17 }
 0x1af   :  { %v762_v22 = vpop.f32.mrf.mxu2  ;;  %v802_v44 = vadd.f32 %v801_v15, %v789_v39 }
 0x1b0   :  { %v763_v2 = vadd.f32 %v762_v22, %v639_v17 }
 0x1b1   :  { %v736_v61 = vpop.f32.mrf.mxu3  ;;  %v2531_v37 = vmul.f32 %v811_v12, %v802_v44 }
 0x1b2   :  { %v737_v60 = vadd.f32 %v736_v61, %v639_v17  ;;  %v776_v57 = vadd.f32 %v775_v63, %v763_v2 }
 0x1b3   :  { %v1641_v36 = vpack.i.bf16 %v2522_v25, %v2531_v37 }
 0x1b4   :  { %v750_v45 = vadd.f32 %v749_v53, %v737_v60  ;;  %v790_v7 = vpop.f32.mrf.mxu0  ;;  %v2538_v47 = vmul.f32 %v810_v27, %v776_v57 }
 0x1b6   :  { %v2524_v51 = vmul.f32 %v809_v18, %v750_v45  ;;  %v1646_v20 = vpack.i.bf16 %v2531_v37, %v2538_v47 }
 0x1b7   :  { %v764_v41 = vpop.f32.mrf.mxu2 }
 0x1b8   :  { %v1601_v23 = vpack.i.bf16 %v2524_v51, %v2522_v25  ;;  %v1631_v8 = vpack.i.bf16 %v2538_v47, %v2524_v51 }
 0x1b9   :  { %v738_v42 = vpop.f32.mrf.mxu3 }
 0x1ba   :  { %1602 = vrot.lane.b32.xlu2 %v1601_v23, %s1759_s12  ;;  %1617 = vrot.lane.b32.xlu0 %v1601_v23, %s1757_s1 }
 0x1bb   :  { %1612 = vrot.lane.b32.xlu1 %v1601_v23, %s1756_s0 }
 0x1c2   :  { %1607 = vrot.lane.b32.xlu2 %v1601_v23, %s1758_s11  ;;  %1642 = vrot.lane.b32.xlu0 %v1641_v36, %s1763_s16 }
 0x1c3   :  { %1627 = vrot.lane.b32.xlu1 %v1641_v36, %s1760_s13 }
 0x1ca   :  { %1622 = vrot.lane.b32.xlu2 %v1641_v36, %s1762_s15  ;;  %1647 = vrot.lane.b32.xlu0 %v1646_v20, %s1759_s12 }
 0x1cb   :  { %1632 = vrot.lane.b32.xlu1 %v1631_v8, %s1762_s15 }
 0x1d2   :  { %1637 = vrot.lane.b32.xlu2 %v1631_v8, %s1760_s13  ;;  %1662 = vrot.lane.b32.xlu0 %v1646_v20, %s1757_s1 }
 0x1d3   :  { %1652 = vrot.lane.b32.xlu1 %v1646_v20, %s1758_s11 }
 0x1da   :  { %871 = vrot.lane.b32.xlu2 %v2531_v37, %s1761_s14  ;;  %1667 = vrot.lane.b32.xlu0 %v1631_v8, %s1763_s16 }
 0x1db   :  { %1672 = vrot.lane.b32.xlu1 %v1601_v23, %s1761_s14 }
 0x1e2   :  { %1657 = vrot.lane.b32.xlu2 %v1646_v20, %s1756_s0  ;;  %1086 = vperm.xlu0 %1560, %v1083_v43   ;;  %v2572_v3 = vpop.permute.xlu2 %1577 }
 0x1e3   :  { %v1580_v9 = vunpack.i.h.bf16 %v2572_v3  ;;  %v1579_v55 = vunpack.i.l.bf16 %v2572_v3 }
 0x1e5   :  { %v931_v46 = vsel %vm494_vm2, %v1579_v55, %v1580_v9 }
 0x1ea   :  { %869 = vrot.lane.b32.xlu2 %v2538_v47, %s1761_s14  ;;  %v2595_v14 = vpop.permute.xlu2 %1592 }
 0x1fa   :  { %v2560_v52 = vpop.permute.xlu0 %1572 }
 0x1fb   :  { %v2562_v48 = vpop.permute.xlu1 %1562  ;;  %v1575_v50 = vunpack.i.h.bf16 %v2560_v52  ;;  %v1574_v29 = vunpack.i.l.bf16 %v2560_v52 }
 0x1fc   :  { %v1565_v59 = vunpack.i.h.bf16 %v2562_v48  ;;  %v1564_v54 = vunpack.i.l.bf16 %v2562_v48 }
 0x1fd   :  { %v949_v5 = vsel %vm531_vm1, %v1574_v29, %v1575_v50 }
 0x1fe   :  { %v967_v35 = vsel %vm568_vm4, %v1564_v54, %v1565_v59  ;;  %v1029_v30 = vrot.slane %v949_v5, 4  ;;  %v1595_v5 = vunpack.i.h.bf16 %v2595_v14 }
 0x1ff   :  { %v1077_v17 = vpack.c.bf16 %v967_v35, %v967_v35 }
 0x200   :  { %v1059_v62 = vsel %vm268_vm0, %v931_v46, %v1029_v30 }
 0x201   :  { %v1095_v38 = vsel %vm1093_vm10, %v1077_v17, 0 }
 0x202   :  { %1117 = vmatpush.bf16.msrb.mxu3 %v1095_v38  ;;  %v2616_v61 = vpop.permute.xlu0 %1587 }
 0x203   :  { %v2581_v24 = vpop.permute.xlu1 %1567  ;;  %v1590_v39 = vunpack.i.h.bf16 %v2616_v61  ;;  %v1589_v45 = vunpack.i.l.bf16 %v2616_v61 }
 0x204   :  { %v1570_v33 = vunpack.i.h.bf16 %v2581_v24  ;;  %v1569_v34 = vunpack.i.l.bf16 %v2581_v24 }
 0x205   :  { %v895_v2 = vsel %vm420_vm5, %v1589_v45, %v1590_v39 }
 0x206   :  { %v913_v58 = vsel %vm457_vm3, %v1569_v34, %v1570_v33 }
 0x207   :  { %v1011_v56 = vrot.slane %v913_v58, 4 }
 0x209   :  { %v1053_v11 = vsel %vm268_vm0, %v2508_v40, %v1011_v56  ;;  %v994_v56 = vrot.slane %v895_v2, 4 }
 0x20a   :  { %v1071_v53 = vpack.c.bf16 %v1059_v62, %v1053_v11 }
 0x20b   :  { %v2612_v4 = vpop.permute.xlu1 %1582 }
 0x20c   :  { %1118 = vmatpush.bf16.msrb.mxu3 %v1071_v53  ;;  %v1585_v7 = vunpack.i.h.bf16 %v2612_v4  ;;  %v1584_v12 = vunpack.i.l.bf16 %v2612_v4 }
 0x20e   :  { %v859_v57 = vsel %vm346_vm7, %v1584_v12, %v1585_v7 }
 0x20f   :  { %v976_v46 = vrot.slane %v859_v57, 4 }
 0x213   :  { %v2620_v19 = vpop.permute.xlu1 %1597 }
 0x214   :  { %v2600_v10 = vpop.permute.xlu2 %1602  ;;  %v1600_v27 = vunpack.i.h.bf16 %v2620_v19  ;;  %v1599_v36 = vunpack.i.l.bf16 %v2620_v19 }
 0x215   :  { %v1605_v31 = vunpack.i.h.bf16 %v2600_v10  ;;  %v1604_v63 = vunpack.i.l.bf16 %v2600_v10 }
 0x216   :  { %v877_v53 = vsel %vm383_vm6, %v1599_v36, %v1600_v27 }
 0x217   :  { %v966_v49 = vsel %vm568_vm4, %v1565_v59, %v1604_v63  ;;  %v965_v26 = vsel %vm568_vm4, %v1604_v63, %v1605_v31 }
 0x218   :  { %v1078_v15 = vpack.c.bf16 %v966_v49, %v966_v49  ;;  %v1079_v40 = vpack.c.bf16 %v965_v26, %v965_v26 }
 0x21a   :  { %v1098_v21 = vsel %vm1093_vm10, %v1078_v15, 0  ;;  %v1101_v32 = vsel %vm1093_vm10, %v1079_v40, 0 }
 0x21b   :  { %1130 = vmatpush.bf16.msra.mxu2 %v1098_v21  ;;  %1143 = vmatpush.bf16.msra.mxu1 %v1101_v32 }
 0x21c   :  { %v2614_v22 = vpop.permute.xlu2 %1607 }
 0x21d   :  { %v1610_v60 = vunpack.i.h.bf16 %v2614_v22  ;;  %v1609_v18 = vunpack.i.l.bf16 %v2614_v22 }
 0x21f   :  { %v911_v44 = vsel %vm457_vm3, %v1609_v18, %v1610_v60  ;;  %v912_v23 = vsel %vm457_vm3, %v1570_v33, %v1609_v18  ;;  %v1594_v33 = vunpack.i.l.bf16 %v2595_v14 }
 0x220   :  { %v1012_v17 = vrot.slane %v912_v23, 4  ;;  %v1013_v38 = vrot.slane %v911_v44, 4 }
 0x222   :  { %v1055_v40 = vsel %vm268_vm0, %v2522_v25, %v1013_v38 }
 0x224   :  { %v2618_v13 = vpop.permute.xlu2 %1622 }
 0x225   :  { %v1624_v63 = vunpack.i.l.bf16 %v2618_v13 }
 0x227   :  { %v860_v25 = vsel %vm346_vm7, %v1624_v63, %v1584_v12 }
 0x22c   :  { %v2634_v42 = vpop.permute.xlu2 %1637  ;;  %v2636_v41 = vpop.permute.xlu0 %1617 }
 0x22d   :  { %v2648_v20 = vpop.permute.xlu1 %1612  ;;  %v1620_v8 = vunpack.i.h.bf16 %v2636_v41  ;;  %v1619_v43 = vunpack.i.l.bf16 %v2636_v41  ;;  %v1640_v12 = vunpack.i.h.bf16 %v2634_v42 }
 0x22e   :  { %v1615_v59 = vunpack.i.h.bf16 %v2648_v20  ;;  %v1614_v35 = vunpack.i.l.bf16 %v2648_v20 }
 0x22f   :  { %v929_v49 = vsel %vm494_vm2, %v1619_v43, %v1620_v8  ;;  %v930_v26 = vsel %vm494_vm2, %v1580_v9, %v1619_v43  ;;  %v1048_v9 = vsel %vm268_vm0, %v877_v53, %v994_v56 }
 0x230   :  { %v947_v30 = vsel %vm531_vm1, %v1614_v35, %v1615_v59  ;;  %v948_v58 = vsel %vm531_vm1, %v1575_v50, %v1614_v35  ;;  %v1054_v50 = vsel %vm268_vm0, %v2510_v16, %v1012_v17  ;;  %v841_v16 = vsel %vm309_vm9, %v1594_v33, %v1595_v5 }
 0x231   :  { %v1030_v11 = vrot.slane %v948_v58, 4  ;;  %v1031_v62 = vrot.slane %v947_v30, 4  ;;  %v1042_v35 = vsel %vm268_vm0, %v841_v16, %v976_v46  ;;  %v975_v58 = vrot.slane %v860_v25, 4 }
 0x232   :  { %v1066_v30 = vpack.c.bf16 %v1048_v9, %v1042_v35 }
 0x233   :  { %v1060_v15 = vsel %vm268_vm0, %v930_v26, %v1030_v11  ;;  %v1061_v21 = vsel %vm268_vm0, %v929_v49, %v1031_v62  ;;  %v1625_v11 = vunpack.i.h.bf16 %v2618_v13  ;;  %v1639_v62 = vunpack.i.l.bf16 %v2634_v42 }
 0x234   :  { %v2681_v32 = vpop.permute.xlu2 %871  ;;  %v2683_v18 = vpop.permute.xlu0 %1642  ;;  %v1072_v44 = vpack.c.bf16 %v1060_v15, %v1054_v50  ;;  %v1073_v23 = vpack.c.bf16 %v1061_v21, %v1055_v40 }
 0x235   :  { %v1644_v2 = vunpack.i.l.bf16 %v2683_v18  ;;  %v1628_v57 = vpop.permute.xlu1 %1627  ;;  %v878_v46 = vsel %vm383_vm6, %v2681_v32, %v1599_v36  ;;  %v1645_v15 = vunpack.i.h.bf16 %v2683_v18  ;;  %v858_v36 = vsel %vm346_vm7, %v1585_v7, %v1625_v11 }
 0x236   :  { %v1629_v43 = vunpack.i.l.bf16 %v1628_v57  ;;  %1131 = vmatpush.bf16.msra.mxu2 %v1072_v44  ;;  %1144 = vmatpush.bf16.msra.mxu1 %v1073_v23  ;;  %v2726_v44 = vsel %vm420_vm5, %v1639_v62, %v1640_v12  ;;  %v977_v35 = vrot.slane %v858_v36, 4 }
 0x237   :  { %v842_v17 = vsel %vm309_vm9, %v1644_v2, %v1594_v33  ;;  %v2711_v33 = vld [vmem:[%s2874_s3] sm:$0xf]  ;;  %v840_v61 = vsel %vm309_vm9, %v1595_v5, %v1645_v15  ;;  %s1765_s3 = smov [#allocation7]  }
 0x238   :  { %v896_v38 = vsel %vm420_vm5, %v1629_v43, %v1589_v45  ;;  %v1630_v45 = vunpack.i.h.bf16 %v1628_v57  ;;  %v1041_v53 = vsel %vm268_vm0, %v842_v17, %v975_v58  ;;  %v2744_v7 = vsel %vm420_vm5, %v1640_v12, %v1629_v43  ;;  %s1283_s23 = sshll.u32 %s1765_s3, 4  ;;  %s1284_s23 = int_to_ptr.vmem [resolvable:$true] %s1283_s23 }
 0x239   :  { %v993_v56 = vrot.slane %v896_v38, 4  ;;  %v997_v17 = vrot.slane %v2726_v44, 4  ;;  %v998_v14 = vrot.slane %v2744_v7, 4  ;;  %v1196_v44 = vld.sshfl [vmem:[#allocation1 + $0x8] sm:$0xff pattern:$0x75316420] }
 0x23a   :  { %1132 = vmatpush.bf16.msra.mxu2 %v1066_v30  ;;  %v2730_v57 = vsel %vm420_vm5, %v1630_v45, %v1639_v62  ;;  %v2736_v9 = vsel %vm420_vm5, %v1590_v39, %v1630_v45  ;;  %v2776_v62 = vsel %vm268_vm0, %v840_v61, %v977_v35 }
 0x23b   :  { %v1047_v49 = vsel %vm268_vm0, %v878_v46, %v993_v56  ;;  %v996_v39 = vrot.slane %v2730_v57, 4  ;;  %v1195_v57 = vld.sshfl [vmem:[#allocation1] sm:$0xff pattern:$0x75316420] }
 0x23c   :  { %v1648_v26 = vpop.permute.xlu0 %1647  ;;  %v1065_v50 = vpack.c.bf16 %v1047_v49, %v1041_v53  ;;  %v1658_v42 = vpop.permute.xlu2 %1657  ;;  %1237 = vst [vmem:[#allocation1] ss:$2 sm:$0xff] %v1815_v1 }
 0x23d   :  { %v1649_v40 = vunpack.i.l.bf16 %v1648_v26  ;;  %v1633_v21 = vpop.permute.xlu1 %1632  ;;  %1303 = vmatmul.msk.bf16.vlgmr.msra.gmra.mxu2 %vm1089_vm11, %v2711_v33  ;;  %v1650_v23 = vunpack.i.h.bf16 %v1648_v26  ;;  %v1660_v16 = vunpack.i.h.bf16 %v1658_v42  ;;  %v1659_v25 = vunpack.i.l.bf16 %v1658_v42 }
 0x23e   :  { %1119 = vmatpush.bf16.msrb.mxu3 %v1065_v50  ;;  %v1635_v46 = vunpack.i.h.bf16 %v1633_v21  ;;  %v1634_v26 = vunpack.i.l.bf16 %v1633_v21 }
 0x23f   :  { %v964_v4 = vsel %vm568_vm4, %v1605_v31, %v1649_v40  ;;  %v995_v31 = vrot.slane %v2736_v9, 4  ;;  %v963_v43 = vsel %vm568_vm4, %v1649_v40, %v1650_v23  ;;  %v968_v38 = vsel %vm568_vm4, %v1650_v23, %v1564_v54  ;;  %v1197_v9 = vld.sshfl [vmem:[#allocation1 + $0x10] sm:$0xff pattern:$0x75316420] }
 0x240   :  { %v1080_v10 = vpack.c.bf16 %v964_v4, %v964_v4  ;;  %v1081_v30 = vpack.c.bf16 %v963_v43, %v963_v43  ;;  %v1082_v58 = vpack.c.bf16 %v968_v38, %v968_v38  ;;  %v945_v56 = vsel %vm531_vm1, %v1659_v25, %v1660_v16 }
 0x241   :  { %1302 = vmatmul.msk.bf16.vlgmr.msrb.gmra.mxu3 %vm1089_vm11, %v2711_v33  ;;  %v946_v12 = vsel %vm531_vm1, %v1615_v59, %v1659_v25  ;;  %v950_v48 = vsel %vm531_vm1, %v1660_v16, %v1574_v29  ;;  %v1033_v29 = vrot.slane %v945_v56, 4  ;;  %v855_v3 = vsel %vm346_vm7, %v1635_v46, %v1624_v63 }
 0x242   :  { %v1104_v5 = vsel %vm1093_vm10, %v1080_v10, 0  ;;  %v1107_v45 = vsel %vm1093_vm10, %v1081_v30, 0  ;;  %v1110_v53 = vsel %vm1093_vm10, %v1082_v58, 0  ;;  %v1032_v42 = vrot.slane %v946_v12, 4 }
 0x243   :  { %1156 = vmatpush.bf16.msra.mxu3 %v1104_v5  ;;  %1169 = vmatpush.bf16.msrb.mxu0 %v1107_v45  ;;  %v1034_v40 = vrot.slane %v950_v48, 4  ;;  %v856_v25 = vsel %vm346_vm7, %v1634_v26, %v1635_v46  ;;  %v857_v22 = vsel %vm346_vm7, %v1625_v11, %v1634_v26  ;;  %v980_v5 = vrot.slane %v855_v3, 4  ;;  %v1242_v3 = vld.sshfl [vmem:[#allocation1] sm:$0xff pattern:$0x75316420] }
 0x244   :  { %v1663_v54 = vpop.permute.xlu0 %1662  ;;  %1182 = vmatpush.bf16.msrb.mxu2 %v1110_v53  ;;  %v978_v12 = vrot.slane %v857_v22, 4  ;;  %v979_v48 = vrot.slane %v856_v25, 4 }
 0x245   :  { %v1665_v49 = vunpack.i.h.bf16 %v1663_v54  ;;  %v1653_v20 = vpop.permute.xlu1 %1652  ;;  %v1664_v59 = vunpack.i.l.bf16 %v1663_v54 }
 0x246   :  { %v1655_v52 = vunpack.i.h.bf16 %v1653_v20  ;;  %v1654_v50 = vunpack.i.l.bf16 %v1653_v20 }
 0x247   :  { %v932_v36 = vsel %vm494_vm2, %v1665_v49, %v1579_v55  ;;  %v927_v23 = vsel %vm494_vm2, %v1664_v59, %v1665_v49  ;;  %v928_v21 = vsel %vm494_vm2, %v1620_v8, %v1664_v59  ;;  %v870_v55 = vpop.permute.xlu2 %869 }
 0x248   :  { %v909_v4 = vsel %vm457_vm3, %v1654_v50, %v1655_v52  ;;  %v910_v7 = vsel %vm457_vm3, %v1610_v60, %v1654_v50  ;;  %v914_v41 = vsel %vm457_vm3, %v1655_v52, %v1569_v34  ;;  %v1064_v35 = vsel %vm268_vm0, %v932_v36, %v1034_v40 }
 0x249   :  { %v1014_v8 = vrot.slane %v910_v7, 4  ;;  %v1015_v16 = vrot.slane %v909_v4, 4  ;;  %v1016_v60 = vrot.slane %v914_v41, 4  ;;  %v1062_v24 = vsel %vm268_vm0, %v928_v21, %v1032_v42 }
 0x24a   :  { %v1063_v61 = vsel %vm268_vm0, %v927_v23, %v1033_v29  ;;  %v873_v13 = vsel %vm383_vm6, %v870_v55, %v2681_v32  ;;  %v1243_v23 = vld.sshfl [vmem:[#allocation1 + $0x8] sm:$0xff pattern:$0x75316420] }
 0x24b   :  { %v1056_v63 = vsel %vm268_vm0, %v2524_v51, %v1014_v8  ;;  %v1057_v34 = vsel %vm268_vm0, %v2538_v47, %v1015_v16  ;;  %v1058_v38 = vsel %vm268_vm0, %v2531_v37, %v1016_v60  ;;  %v1052_v46 = vsel %vm268_vm0, %v873_v13, %v998_v14 }
 0x24c   :  { %v1668_v10 = vpop.permute.xlu0 %1667  ;;  %v1074_v43 = vpack.c.bf16 %v1062_v24, %v1056_v63  ;;  %v1075_v11 = vpack.c.bf16 %v1063_v61, %v1057_v34  ;;  %v1076_v56 = vpack.c.bf16 %v1064_v35, %v1058_v38 }
 0x24d   :  { %v1670_v30 = vunpack.i.h.bf16 %v1668_v10  ;;  %v1669_v51 = vunpack.i.l.bf16 %v1668_v10  ;;  %v1673_v58 = vpop.permute.xlu1 %1672 }
 0x24e   :  { %v1675_v47 = vunpack.i.h.bf16 %v1673_v58  ;;  %v1674_v54 = vunpack.i.l.bf16 %v1673_v58  ;;  %1157 = vmatpush.bf16.msra.mxu3 %v1074_v43  ;;  %1170 = vmatpush.bf16.msrb.mxu0 %v1075_v11 }
 0x24f   :  { %v837_v32 = vsel %vm309_vm9, %v1670_v30, %v1644_v2  ;;  %v838_v37 = vsel %vm309_vm9, %v1669_v51, %v1670_v30  ;;  %v839_v45 = vsel %vm309_vm9, %v1645_v15, %v1669_v51  ;;  %1183 = vmatpush.bf16.msrb.mxu2 %v1076_v56 }
 0x250   :  { %v874_v53 = vsel %vm383_vm6, %v1675_v47, %v870_v55  ;;  %v875_v14 = vsel %vm383_vm6, %v1674_v54, %v1675_v47  ;;  %v876_v2 = vsel %vm383_vm6, %v1600_v27, %v1674_v54  ;;  %v1044_v49 = vsel %vm268_vm0, %v839_v45, %v978_v12 }
 0x251   :  { %v1049_v18 = vsel %vm268_vm0, %v876_v2, %v995_v31  ;;  %v1050_v15 = vsel %vm268_vm0, %v875_v14, %v996_v39  ;;  %v1045_v20 = vsel %vm268_vm0, %v838_v37, %v979_v48  ;;  %v1051_v26 = vsel %vm268_vm0, %v874_v53, %v997_v17  ;;  %v1199_v17 = vld.sshfl [vmem:[#allocation1 + $0x20] sm:$0xff pattern:$0x75316420]  ;;  %v1198_v31 = vld.sshfl [vmem:[#allocation1 + $0x18] sm:$0xff pattern:$0x75316420] }
 0x252   :  { %v1067_v19 = vpack.c.bf16 %v1049_v18, %v2776_v62  ;;  %v1068_v28 = vpack.c.bf16 %v1050_v15, %v1044_v49  ;;  %v1069_v27 = vpack.c.bf16 %v1051_v26, %v1045_v20  ;;  %v1046_v59 = vsel %vm268_vm0, %v837_v32, %v980_v5  ;;  %v1200_v39 = vld.sshfl [vmem:[#allocation1 + $0x28] sm:$0xff pattern:$0x75316420]  ;;  %1239 = vst [vmem:[#allocation1 + $0x10] ss:$2 sm:$0xff] %v1812_v0 }
 0x253   :  { %v1070_v52 = vpack.c.bf16 %v1052_v46, %v1046_v59  ;;  %1241 = vst [vmem:[#allocation1 + $0x20] ss:$2 sm:$0xff] %v1826_v6 }
 0x254   :  { %1145 = vmatpush.bf16.msra.mxu1 %v1067_v19  ;;  %1158 = vmatpush.bf16.msra.mxu3 %v1068_v28  ;;  %v1087_v62 = vpop.permute.xlu0 %1086 }
 0x255   :  { %1171 = vmatpush.bf16.msrb.mxu0 %v1069_v27  ;;  %1184 = vmatpush.bf16.msrb.mxu2 %v1070_v52 }
 0x257   :  { %1304 = vmatmul.msk.bf16.vlgmr.msra.gmra.mxu1 %vm1089_vm11, %v2711_v33  ;;  %1305 = vmatmul.msk.bf16.vlgmr.msra.gmra.mxu3 %vm1089_vm11, %v2711_v33 }
 0x258   :  { %1306 = vmatmul.msk.bf16.vlgmr.msrb.gmra.mxu0 %vm1089_vm11, %v2711_v33  ;;  %1307 = vmatmul.msk.bf16.vlgmr.msrb.gmra.mxu2 %vm1089_vm11, %v2711_v33 }
 0x259   :  { %v1245_v58 = vld.sshfl [vmem:[#allocation1 + $0x18] sm:$0xff pattern:$0x75316420]  ;;  %v1244_v37 = vld.sshfl [vmem:[#allocation1 + $0x10] sm:$0xff pattern:$0x75316420] }
 0x25a   :  { %v1247_v54 = vld.sshfl [vmem:[#allocation1 + $0x28] sm:$0xff pattern:$0x75316420]  ;;  %v1246_v53 = vld.sshfl [vmem:[#allocation1 + $0x20] sm:$0xff pattern:$0x75316420] }
 0x2c0   :  { %v1134_v50 = vpop.f32.mrf.mxu2 }
 0x2c1   :  { %v1135_v42 = vadd.f32 %v1134_v50, %v1087_v62 }
 0x2c3   :  { %v1208_v29 = vmul.f32 %v1196_v44, %v1135_v42  ;;  %v1220_v40 = vrot.slane %v1135_v42, 4 }
 0x2c4   :  { %v1121_v36 = vpop.f32.mrf.mxu3 }
 0x2c5   :  { %v1232_v33 = vadd.f32 %v1220_v40, %v1208_v29  ;;  %v1122_v21 = vadd.f32 %v1121_v36, %v1087_v62 }
 0x2c7   :  { %v1207_v4 = vmul.f32 %v1195_v57, %v1122_v21  ;;  %v1219_v7 = vrot.slane %v1122_v21, 4  ;;  %v1255_v1 = vadd.f32 %v1243_v23, %v1232_v33 }
 0x2c8   :  { %v1136_v55 = vpop.f32.mrf.mxu2 }
 0x2c9   :  { %v1231_v41 = vadd.f32 %v1219_v7, %v1207_v4  ;;  %v1266_v16 = vrot.slane %v1255_v1, 4 }
 0x2cb   :  { %v1254_v8 = vadd.f32 %v1242_v3, %v1231_v41 }
 0x2cc   :  { %v1123_v0 = vpop.f32.mrf.mxu3 }
 0x2cd   :  { %v1269_v6 = vsel %vm268_vm0, %v1254_v8, %v1266_v16 }
 0x2ce   :  { %1275 = vst [vmem:[#allocation7] sm:$0xff] %v1269_v6 }
 0x2d4   :  { %v1147_v25 = vpop.f32.mrf.mxu1 }
 0x2d5   :  { %v1173_v22 = vpop.f32.mrf.mxu0  ;;  %v1148_v60 = vadd.f32 %v1147_v25, %v1087_v62 }
 0x2d6   :  { %v1174_v35 = vadd.f32 %v1173_v22, %v1087_v62 }
 0x2d7   :  { %v1209_v24 = vmul.f32 %v1197_v9, %v1148_v60  ;;  %v1221_v34 = vrot.slane %v1148_v60, 4 }
 0x2d8   :  { %v1211_v10 = vmul.f32 %v1199_v17, %v1174_v35  ;;  %v1223_v43 = vrot.slane %v1174_v35, 4 }
 0x2d9   :  { %v1233_v48 = vadd.f32 %v1221_v34, %v1209_v24 }
 0x2da   :  { %v1160_v63 = vpop.f32.mrf.mxu3  ;;  %v1235_v46 = vadd.f32 %v1223_v43, %v1211_v10 }
 0x2db   :  { %v1161_v61 = vadd.f32 %v1160_v63, %v1087_v62  ;;  %v1186_v13 = vpop.f32.mrf.mxu2  ;;  %v1256_v15 = vadd.f32 %v1244_v37, %v1233_v48 }
 0x2dc   :  { %v1187_v11 = vadd.f32 %v1186_v13, %v1087_v62  ;;  %v1149_v38 = vpop.f32.mrf.mxu1  ;;  %v1258_v26 = vadd.f32 %v1246_v53, %v1235_v46 }
 0x2dd   :  { %v1210_v5 = vmul.f32 %v1198_v31, %v1161_v61  ;;  %v1222_v30 = vrot.slane %v1161_v61, 4  ;;  %v1175_v51 = vpop.f32.mrf.mxu0 }
 0x2de   :  { %v1212_v56 = vmul.f32 %v1200_v39, %v1187_v11  ;;  %v1224_v12 = vrot.slane %v1187_v11, 4 }
 0x2df   :  { %v1234_v47 = vadd.f32 %v1222_v30, %v1210_v5 }
 0x2e0   :  { %v1236_v32 = vadd.f32 %v1224_v12, %v1212_v56 }
 0x2e1   :  { %v1257_v45 = vadd.f32 %v1245_v58, %v1234_v47 }
 0x2e2   :  { %v1259_v14 = vadd.f32 %v1247_v54, %v1236_v32  ;;  %v1162_v2 = vpop.f32.mrf.mxu3 }
 0x2e3   :  { %v1267_v49 = vrot.slane %v1257_v45, 4  ;;  %v1188_v18 = vpop.f32.mrf.mxu2 }
 0x2e4   :  { %v1268_v20 = vrot.slane %v1259_v14, 4 }
 0x2e5   :  { %v1270_v19 = vsel %vm268_vm0, %v1256_v15, %v1267_v49 }
 0x2e6   :  { %v1271_v28 = vsel %vm268_vm0, %v1258_v26, %v1268_v20  ;;  %1276 = vst [vmem:[#allocation7 + $0x8] sm:$0xff] %v1270_v19 }
 0x2e7   :  { %1277 = vst [vmem:[#allocation7 + $0x10] sm:$0xff] %v1271_v28 }
 0x2e8   :  { %1288 = dma.vmem_to_hbm [thread:$0]  %s1284_s23, 384, %s1286_s26, [#allocation4]  }
 0x2e9   :  { %1752 = dma.done.wait [#allocation4], 384  }
 0x2ea   :  { %1753 = vsyncadd [#allocation4], 4294966912 }
 0x2eb   :  { %1293 = vsyncpa [#allocation3], 1 }
 0x2ec   :  { %1294 = vsyncpa [#allocation6], 1 }
 0x2ed   :  { %1295 = vsyncpa [#allocation4], 1 }

</bundles_post_ra>
